<compile_context>
chip_gen: v6e
topology: v6e:2x2x1
jax: 0.10.0
libtpu: 0.0.40
codegen_flags: <defaults>
</compile_context>

<pallas_src>
import math
import functools

import numpy as np
import jax
import jax.numpy as jnp
from jax.experimental import pallas as pl
from jax.experimental.pallas import tpu as pltpu


# ----------------------------------------------------------------------------
# Pallas kernels
# ----------------------------------------------------------------------------

def _conv3x3_kernel(x_ref, w_ref, b_ref, o_ref, xpad_ref, act_ref, *, dil, relu, pool):
    """Dilated 3x3 conv (+bias, optional ReLU, optional fused 2x2/s2 maxpool) for one
    (batch element, Cout tile).

    x_ref   : (1, H, W, Cin)    bf16  unpadded input block
    w_ref   : (9, Cin, TC)      bf16  per-tap weights (tap index = dy*3 + dx)
    b_ref   : (1, TC)           f32   bias
    o_ref   : (1, Ho, Wo, TC)   bf16  output (Ho = H/2 when pooled)
    xpad_ref: (H+2d, W+2d, Cin) f32   zero-padded input scratch (in-kernel padding)
    act_ref : (H, W, TC)        f32   pre-pool activation scratch (used iff pool)
    """
    _, H, W, Cin = x_ref.shape
    tc = o_ref.shape[-1]

    # In-kernel zero padding: no wrapper-side jnp.pad -> no extra HBM round trip.
    xpad_ref[...] = jnp.zeros(xpad_ref.shape, xpad_ref.dtype)
    xpad_ref[pl.ds(dil, H), pl.ds(dil, W), :] = x_ref[0].astype(jnp.float32)
    bias = b_ref[...]

    def conv_rows(row0, nrows):
        """(nrows*W, tc) f32 conv output for output rows [row0, row0 + nrows)."""
        acc = jnp.zeros((nrows * W, tc), jnp.float32)
        for dy in range(3):
            for dx in range(3):
                tap = xpad_ref[pl.ds(row0 + dy * dil, nrows), pl.ds(dx * dil, W), :]
                tap = tap.reshape(nrows * W, Cin).astype(jnp.bfloat16)
                acc = acc + jnp.dot(tap, w_ref[dy * 3 + dx],
                                    preferred_element_type=jnp.float32)
        acc = acc + bias
        if relu:
            acc = jnp.maximum(acc, 0.0)
        return acc

    if W % 8 == 0:
        # Sublane-aligned width: whole image in 9 accumulated MXU matmuls
        # (the (H, W, Cin) -> (H*W, Cin) collapse is layout-free when W % 8 == 0).
        y = conv_rows(0, H)
        if pool:
            act_ref[...] = y.reshape(H, W, tc)
        else:
            o_ref[0] = y.reshape(H, W, tc).astype(o_ref.dtype)
    else:
        # Small feature maps (W not a multiple of 8): per-row matmuls, no value reshape
        # across tile boundaries.
        for h in range(H):
            row = conv_rows(h, 1)                                   # (W, tc)
            if pool:
                act_ref[h] = row
            else:
                o_ref[0, h] = row.astype(o_ref.dtype)

    if pool:
        # Fused 2x2 / stride-2 max pool on the VMEM activation (strided pl.ds reads);
        # the pre-pool activation is never written to HBM.
        Ho, Wo = H // 2, W // 2
        p = jnp.maximum(
            jnp.maximum(act_ref[pl.ds(0, Ho, stride=2), pl.ds(0, Wo, stride=2), :],
                        act_ref[pl.ds(0, Ho, stride=2), pl.ds(1, Wo, stride=2), :]),
            jnp.maximum(act_ref[pl.ds(1, Ho, stride=2), pl.ds(0, Wo, stride=2), :],
                        act_ref[pl.ds(1, Ho, stride=2), pl.ds(1, Wo, stride=2), :]))
        o_ref[0] = p.astype(o_ref.dtype)


def _maxpool3x3s1_kernel(x_ref, o_ref, pad_ref):
    """MaxPool2d(3, stride=1, padding=1); -inf padding built in-kernel in VMEM.

    x_ref: (1, H, W, C) bf16; pad_ref: (H+2, W+2, C) f32 scratch; o_ref: (1, H, W, C).
    """
    _, H, W, C = x_ref.shape
    pad_ref[...] = jnp.full(pad_ref.shape, -jnp.inf, pad_ref.dtype)
    pad_ref[pl.ds(1, H), pl.ds(1, W), :] = x_ref[0].astype(jnp.float32)
    acc = pad_ref[pl.ds(0, H), pl.ds(0, W), :]
    for dy in range(3):
        for dx in range(3):
            if dy == 0 and dx == 0:
                continue
            acc = jnp.maximum(acc, pad_ref[pl.ds(dy, H), pl.ds(dx, W), :])
    o_ref[0] = acc.astype(o_ref.dtype)


def _head_kernel(x_ref, w1_ref, b1_ref, w2_ref, b2_ref, o_ref):
    """Fused fc1 -> fc2 (both 1x1 convs, no activation) of the atrous head.

    x_ref: (TR, Cin) bf16; w1: (Cin, Cin) bf16; w2: (Cin, Cpad) bf16; biases f32;
    o_ref: (TR, Cpad) f32 (Cpad = num_classes padded to 128 lanes).
    """
    x = x_ref[...].astype(jnp.bfloat16)
    h = jnp.dot(x, w1_ref[...], preferred_element_type=jnp.float32) + b1_ref[...]
    y = jnp.dot(h.astype(jnp.bfloat16), w2_ref[...],
                preferred_element_type=jnp.float32) + b2_ref[...]
    o_ref[...] = y


def _upsample_kernel(mh_ref, mw_ref, x_ref, o_ref):
    """Fused separable bilinear upsample for one batch element.

    mh_ref: (Ho, H) f32; mw_ref: (Wo, W) f32; x_ref: (1, H, W*C) f32 (lane-flattened);
    o_ref: (1, Ho, Wo, C) f32.  Pass 1 (H) is an MXU matmul; pass 2 (W) is a small
    broadcast-FMA loop on the VMEM intermediate (W is tiny at the head's resolution).
    """
    _, Ho, Wo, C = o_ref.shape
    W = x_ref.shape[2] // C
    t = jnp.dot(mh_ref[...], x_ref[0], preferred_element_type=jnp.float32)  # (Ho, W*C)
    acc = jnp.zeros((Ho, Wo, C), jnp.float32)
    for w in range(W):
        col = t[:, w * C:(w + 1) * C]                       # (Ho, C)
        wts = mw_ref[:, w:w + 1].reshape(1, Wo, 1)          # (1, Wo, 1)
        acc = acc + col[:, None, :] * wts
    o_ref[0] = acc


# ----------------------------------------------------------------------------
# Wrappers (BlockSpecs, grids, layout plumbing)
# ----------------------------------------------------------------------------

def conv3x3_pallas(x, w9, b, *, rate, relu, pool2=False, tc_max=256):
    """x: (N, H, W, Cin) bf16; w9: (9, Cin, Cout) bf16; b: (1, Cout) f32."""
    N, H, W, Cin = x.shape
    Cout = w9.shape[-1]
    tc = min(Cout, tc_max)
    assert Cout % tc == 0
    if pool2:
        assert H % 2 == 0 and W % 2 == 0
    Ho, Wo = (H // 2, W // 2) if pool2 else (H, W)
    Hp, Wp = H + 2 * rate, W + 2 * rate
    kernel = functools.partial(_conv3x3_kernel, dil=rate, relu=relu, pool=pool2)
    return pl.pallas_call(
        kernel,
        out_shape=jax.ShapeDtypeStruct((N, Ho, Wo, Cout), jnp.bfloat16),
        grid=(N, Cout // tc),
        in_specs=[
            pl.BlockSpec((1, H, W, Cin), lambda n, j: (n, 0, 0, 0)),
            pl.BlockSpec((9, Cin, tc), lambda n, j: (0, 0, j)),
            pl.BlockSpec((1, tc), lambda n, j: (0, j)),
        ],
        out_specs=pl.BlockSpec((1, Ho, Wo, tc), lambda n, j: (n, 0, 0, j)),
        scratch_shapes=[
            pltpu.VMEM((Hp, Wp, Cin), jnp.float32),   # zero-padded input
            pltpu.VMEM((H, W, tc), jnp.float32),      # pre-pool activation
        ],
        compiler_params=pltpu.CompilerParams(
            dimension_semantics=("parallel", "arbitrary")),
    )(x, w9, b)


def maxpool3x3s1_pallas(x):
    """MaxPool2d(3, stride=1, padding=1) on NHWC bf16 input."""
    N, H, W, C = x.shape
    return pl.pallas_call(
        _maxpool3x3s1_kernel,
        out_shape=jax.ShapeDtypeStruct((N, H, W, C), x.dtype),
        grid=(N,),
        in_specs=[pl.BlockSpec((1, H, W, C), lambda n: (n, 0, 0, 0))],
        out_specs=pl.BlockSpec((1, H, W, C), lambda n: (n, 0, 0, 0)),
        scratch_shapes=[pltpu.VMEM((H + 2, W + 2, C), jnp.float32)],
        compiler_params=pltpu.CompilerParams(dimension_semantics=("parallel",)),
    )(x)


def atrous_head_pallas(x, w1, b1, w2, b2, *, row_tile=1024):
    """Fused fc1+fc2.  x: (N, H, W, Cin) bf16 -> (N, H, W, Cpad) f32 (lane-padded)."""
    N, H, W, Cin = x.shape
    Cpad = w2.shape[1]
    rows = N * H * W
    tr = min(rows, row_tile)
    rows_p = pl.cdiv(rows, tr) * tr
    xf = x.reshape(rows, Cin)
    if rows_p != rows:
        xf = jnp.pad(xf, ((0, rows_p - rows), (0, 0)))
    out = pl.pallas_call(
        _head_kernel,
        out_shape=jax.ShapeDtypeStruct((rows_p, Cpad), jnp.float32),
        grid=(rows_p // tr,),
        in_specs=[
            pl.BlockSpec((tr, Cin), lambda i: (i, 0)),
            pl.BlockSpec((Cin, Cin), lambda i: (0, 0)),
            pl.BlockSpec((1, Cin), lambda i: (0, 0)),
            pl.BlockSpec((Cin, Cpad), lambda i: (0, 0)),
            pl.BlockSpec((1, Cpad), lambda i: (0, 0)),
        ],
        out_specs=pl.BlockSpec((tr, Cpad), lambda i: (i, 0)),
        compiler_params=pltpu.CompilerParams(dimension_semantics=("parallel",)),
    )(xf, w1, b1, w2, b2)
    return out[:rows].reshape(N, H, W, Cpad)


def _bilinear_matrix(in_size, out_size):
    """PyTorch bilinear (align_corners=False) interpolation matrix, built on host."""
    scale = in_size / out_size
    i = np.arange(out_size, dtype=np.float64)
    src = np.maximum((i + 0.5) * scale - 0.5, 0.0)       # PyTorch clamps negatives to 0
    i0 = np.minimum(np.floor(src).astype(np.int64), in_size - 1)
    i1 = np.minimum(i0 + 1, in_size - 1)
    lam = src - i0
    M = np.zeros((out_size, in_size), np.float32)
    rows = np.arange(out_size)
    M[rows, i0] += 1.0 - lam
    M[rows, i1] += lam
    return M


def upsample_bilinear_pallas(x, scale):
    """Fused separable bilinear upsample.  x: (N, H, W, C) f32 -> (N, H*s, W*s, C) f32."""
    N, H, W, C = x.shape
    Ho, Wo = H * scale, W * scale
    mh = jnp.asarray(_bilinear_matrix(H, Ho), jnp.float32)
    mw = jnp.asarray(_bilinear_matrix(W, Wo), jnp.float32)
    xf = x.reshape(N, H, W * C)                          # free XLA view, lane-flattened
    return pl.pallas_call(
        _upsample_kernel,
        out_shape=jax.ShapeDtypeStruct((N, Ho, Wo, C), jnp.float32),
        grid=(N,),
        in_specs=[
            pl.BlockSpec((Ho, H), lambda n: (0, 0)),
            pl.BlockSpec((Wo, W), lambda n: (0, 0)),
            pl.BlockSpec((1, H, W * C), lambda n: (n, 0, 0)),
        ],
        out_specs=pl.BlockSpec((1, Ho, Wo, C), lambda n: (n, 0, 0, 0)),
        compiler_params=pltpu.CompilerParams(dimension_semantics=("parallel",)),
    )(mh, mw, xf)


# ----------------------------------------------------------------------------
# Model definition (deterministic parameter init + forward pass)
# ----------------------------------------------------------------------------

def _conv_init(key, kh, kw, cin, cout):
    kw_key, kb_key = jax.random.split(key)
    std = 1.0 / math.sqrt(kh * kw * cin)
    w = jax.random.normal(kw_key, (kh, kw, cin, cout), jnp.float32) * std
    b = jax.random.normal(kb_key, (cout,), jnp.float32) * 0.01
    return w, b


def build_deeplab(key, num_classes, widths=(8, 16, 32, 64)):
    c1, c2, c3, c4 = widths
    # ('conv', cin, cout, rate, relu, fused 2x2/s2 pool)
    specs = [
        # VGG16_feature.features  (2x2/s2 pools fused into the preceding conv)
        ('conv', 3,  c1, 1, True, False), ('conv', c1, c1, 1, True, True),
        ('conv', c1, c2, 1, True, False), ('conv', c2, c2, 1, True, True),
        ('conv', c2, c3, 1, True, False), ('conv', c3, c3, 1, True, False),
        ('conv', c3, c3, 1, True, True),
        ('conv', c3, c4, 1, True, False), ('conv', c4, c4, 1, True, False),
        ('conv', c4, c4, 1, True, False),
        ('pool3',),                                       # MaxPool2d(3, 1, padding=1)
        # VGG16_feature.features2 (dilated, rate=2)
        ('conv', c4, c4, 2, True, False), ('conv', c4, c4, 2, True, False),
        ('conv', c4, c4, 2, True, False),
        ('pool3',),
        # Atrous_module: rate-12 conv (no ReLU) + fused fc1/fc2 head
        ('conv', c4, c4, 12, False, False),
        ('head', c4, num_classes),
    ]
    cpad = ((num_classes + 127) // 128) * 128             # lane-dense head output
    params = []
    for s in specs:
        if s[0] == 'conv':
            key, sub = jax.random.split(key)
            w, b = _conv_init(sub, 3, 3, s[1], s[2])
            params.append((w.reshape(9, s[1], s[2]).astype(jnp.bfloat16),
                           b.reshape(1, s[2])))
        elif s[0] == 'head':
            cin = s[1]
            key, k1 = jax.random.split(key)
            key, k2 = jax.random.split(key)
            w1, b1 = _conv_init(k1, 1, 1, cin, cin)
            w2, b2 = _conv_init(k2, 1, 1, cin, num_classes)
            params.append((
                w1.reshape(cin, cin).astype(jnp.bfloat16),
                b1.reshape(1, cin),
                jnp.pad(w2.reshape(cin, num_classes),
                        ((0, 0), (0, cpad - num_classes))).astype(jnp.bfloat16),
                jnp.pad(b2, (0, cpad - num_classes)).reshape(1, cpad),
            ))
        else:
            params.append(None)
    return specs, params


def deeplab_forward(x_nchw, specs, params, num_classes):
    # NCHW in/out (PyTorch convention); NHWC bf16 activations inside the kernels.
    x = jnp.transpose(x_nchw, (0, 2, 3, 1)).astype(jnp.bfloat16)
    for s, p in zip(specs, params):
        if s[0] == 'conv':
            x = conv3x3_pallas(x, p[0], p[1], rate=s[3], relu=s[4], pool2=s[5])
        elif s[0] == 'pool3':
            x = maxpool3x3s1_pallas(x)
        else:  # head
            w1, b1, w2, b2 = p
            x = atrous_head_pallas(x, w1, b1, w2, b2)      # (N, H, W, Cpad) f32
    y = upsample_bilinear_pallas(x, 8)                     # F.upsample(x8, 'bilinear')
    y = y[..., :num_classes]                               # drop lane padding
    return jnp.transpose(y, (0, 3, 1, 2))                  # NHWC -> NCHW


if __name__ == "__main__":
    key = jax.random.PRNGKey(0)
    k_x, k_p = jax.random.split(key)

    num_classes = 4
    x = jax.random.normal(k_x, (2, 3, 16, 16), jnp.float32)   # NCHW, like PyTorch

    specs, params = build_deeplab(k_p, num_classes)
    out = deeplab_forward(x, specs, params, num_classes)
    out = jax.block_until_ready(out)

    assert out.shape == (2, num_classes, 16, 16), out.shape
    assert bool(jnp.all(jnp.isfinite(out)))
    print("KERNEL_OK")
</pallas_src>

<mosaic_0001>
module attributes {stable_mosaic.version = 11 : i64} {
  func.func @_conv3x3_kernel(%arg0: i32, %arg1: i32, %arg2: memref<1x16x16x3xbf16, #tpu.memory_space<vmem>>, %arg3: memref<9x3x8xbf16, #tpu.memory_space<vmem>>, %arg4: memref<1x8xf32, #tpu.memory_space<vmem>>, %arg5: memref<1x16x16x8xbf16, #tpu.memory_space<vmem>>, %arg6: memref<18x18x3xf32, #tpu.memory_space<vmem>>, %arg7: memref<16x16x8xf32, #tpu.memory_space<vmem>>) attributes {dimension_semantics = [#tpu.dimension_semantics<parallel>, #tpu.dimension_semantics<arbitrary>], iteration_bounds = array<i64: 2, 1>, scalar_prefetch = 0 : i64, scratch_operands = 2 : i64, tpu.core_type = #tpu.core_type<tc>, window_params = [{transform_indices = @transform_0, window_bounds = array<i64: 1, 16, 16, 3>}, {transform_indices = @transform_1, window_bounds = array<i64: 9, 3, 8>}, {transform_indices = @transform_2, window_bounds = array<i64: 1, 8>}, {transform_indices = @transform_3, window_bounds = array<i64: 1, 16, 16, 8>}]} {
    %cst = arith.constant 0.000000e+00 : f32
    %0 = vector.broadcast %cst : f32 to vector<18x18x3xf32>
    %c0 = arith.constant 0 : index
    %c0_0 = arith.constant 0 : index
    %c0_1 = arith.constant 0 : index
    %1 = vector.load %arg6[%c0, %c0_0, %c0_1] : memref<18x18x3xf32, #tpu.memory_space<vmem>>, vector<18x18x3xf32>
    tpu.vector_store %arg6[%c0, %c0_0, %c0_1], %0 {strides = array<i32>} : memref<18x18x3xf32, #tpu.memory_space<vmem>>, vector<18x18x3xf32>,
    %c0_2 = arith.constant 0 : index
    %c0_3 = arith.constant 0 : index
    %c0_4 = arith.constant 0 : index
    %c0_5 = arith.constant 0 : index
    %2 = vector.load %arg2[%c0_2, %c0_3, %c0_4, %c0_5] : memref<1x16x16x3xbf16, #tpu.memory_space<vmem>>, vector<1x16x16x3xbf16>
    %3 = vector.shape_cast %2 : vector<1x16x16x3xbf16> to vector<16x16x3xbf16>
    %4 = arith.extf %3 : vector<16x16x3xbf16> to vector<16x16x3xf32>
    %c1 = arith.constant 1 : index
    %c1_6 = arith.constant 1 : index
    %c0_7 = arith.constant 0 : index
    %5 = vector.load %arg6[%c1, %c1_6, %c0_7] : memref<18x18x3xf32, #tpu.memory_space<vmem>>, vector<16x16x3xf32>
    tpu.vector_store %arg6[%c1, %c1_6, %c0_7], %4 {strides = array<i32>} : memref<18x18x3xf32, #tpu.memory_space<vmem>>, vector<16x16x3xf32>,
    %c0_8 = arith.constant 0 : index
    %c0_9 = arith.constant 0 : index
    %6 = vector.load %arg4[%c0_8, %c0_9] : memref<1x8xf32, #tpu.memory_space<vmem>>, vector<1x8xf32>
    %cst_10 = arith.constant 0.000000e+00 : f32
    %7 = vector.broadcast %cst_10 : f32 to vector<256x8xf32>
    %c0_11 = arith.constant 0 : index
    %c0_12 = arith.constant 0 : index
    %c0_13 = arith.constant 0 : index
    %8 = vector.load %arg6[%c0_11, %c0_12, %c0_13] : memref<18x18x3xf32, #tpu.memory_space<vmem>>, vector<16x16x3xf32>
    %9 = vector.shape_cast %8 : vector<16x16x3xf32> to vector<256x3xf32>
    %10 = arith.truncf %9 : vector<256x3xf32> to vector<256x3xbf16>
    %c0_14 = arith.constant 0 : index
    %c0_15 = arith.constant 0 : index
    %c0_16 = arith.constant 0 : index
    %11 = vector.load %arg3[%c0_14, %c0_15, %c0_16] : memref<9x3x8xbf16, #tpu.memory_space<vmem>>, vector<1x3x8xbf16>
    %12 = vector.shape_cast %11 : vector<1x3x8xbf16> to vector<3x8xbf16>
    %cst_17 = arith.constant dense<0.000000e+00> : vector<256x8xf32>
    %13 = tpu.matmul %10, %12, %cst_17 {dimension_numbers = #tpu.dot_dimension_numbers<[1], [0], [0], [1], [0, 0, 1, 1], [], []>} : vector<256x3xbf16>, vector<3x8xbf16>, vector<256x8xf32> -> vector<256x8xf32>
    %14 = arith.addf %7, %13 : vector<256x8xf32>
    %c0_18 = arith.constant 0 : index
    %c1_19 = arith.constant 1 : index
    %c0_20 = arith.constant 0 : index
    %15 = vector.load %arg6[%c0_18, %c1_19, %c0_20] : memref<18x18x3xf32, #tpu.memory_space<vmem>>, vector<16x16x3xf32>
    %16 = vector.shape_cast %15 : vector<16x16x3xf32> to vector<256x3xf32>
    %17 = arith.truncf %16 : vector<256x3xf32> to vector<256x3xbf16>
    %c1_21 = arith.constant 1 : index
    %c0_22 = arith.constant 0 : index
    %c0_23 = arith.constant 0 : index
    %18 = vector.load %arg3[%c1_21, %c0_22, %c0_23] : memref<9x3x8xbf16, #tpu.memory_space<vmem>>, vector<1x3x8xbf16>
    %19 = vector.shape_cast %18 : vector<1x3x8xbf16> to vector<3x8xbf16>
    %cst_24 = arith.constant dense<0.000000e+00> : vector<256x8xf32>
    %20 = tpu.matmul %17, %19, %cst_24 {dimension_numbers = #tpu.dot_dimension_numbers<[1], [0], [0], [1], [0, 0, 1, 1], [], []>} : vector<256x3xbf16>, vector<3x8xbf16>, vector<256x8xf32> -> vector<256x8xf32>
    %21 = arith.addf %14, %20 : vector<256x8xf32>
    %c0_25 = arith.constant 0 : index
    %c2 = arith.constant 2 : index
    %c0_26 = arith.constant 0 : index
    %22 = vector.load %arg6[%c0_25, %c2, %c0_26] : memref<18x18x3xf32, #tpu.memory_space<vmem>>, vector<16x16x3xf32>
    %23 = vector.shape_cast %22 : vector<16x16x3xf32> to vector<256x3xf32>
    %24 = arith.truncf %23 : vector<256x3xf32> to vector<256x3xbf16>
    %c2_27 = arith.constant 2 : index
    %c0_28 = arith.constant 0 : index
    %c0_29 = arith.constant 0 : index
    %25 = vector.load %arg3[%c2_27, %c0_28, %c0_29] : memref<9x3x8xbf16, #tpu.memory_space<vmem>>, vector<1x3x8xbf16>
    %26 = vector.shape_cast %25 : vector<1x3x8xbf16> to vector<3x8xbf16>
    %cst_30 = arith.constant dense<0.000000e+00> : vector<256x8xf32>
    %27 = tpu.matmul %24, %26, %cst_30 {dimension_numbers = #tpu.dot_dimension_numbers<[1], [0], [0], [1], [0, 0, 1, 1], [], []>} : vector<256x3xbf16>, vector<3x8xbf16>, vector<256x8xf32> -> vector<256x8xf32>
    %28 = arith.addf %21, %27 : vector<256x8xf32>
    %c1_31 = arith.constant 1 : index
    %c0_32 = arith.constant 0 : index
    %c0_33 = arith.constant 0 : index
    %29 = vector.load %arg6[%c1_31, %c0_32, %c0_33] : memref<18x18x3xf32, #tpu.memory_space<vmem>>, vector<16x16x3xf32>
    %30 = vector.shape_cast %29 : vector<16x16x3xf32> to vector<256x3xf32>
    %31 = arith.truncf %30 : vector<256x3xf32> to vector<256x3xbf16>
    %c3 = arith.constant 3 : index
    %c0_34 = arith.constant 0 : index
    %c0_35 = arith.constant 0 : index
    %32 = vector.load %arg3[%c3, %c0_34, %c0_35] : memref<9x3x8xbf16, #tpu.memory_space<vmem>>, vector<1x3x8xbf16>
    %33 = vector.shape_cast %32 : vector<1x3x8xbf16> to vector<3x8xbf16>
    %cst_36 = arith.constant dense<0.000000e+00> : vector<256x8xf32>
    %34 = tpu.matmul %31, %33, %cst_36 {dimension_numbers = #tpu.dot_dimension_numbers<[1], [0], [0], [1], [0, 0, 1, 1], [], []>} : vector<256x3xbf16>, vector<3x8xbf16>, vector<256x8xf32> -> vector<256x8xf32>
    %35 = arith.addf %28, %34 : vector<256x8xf32>
    %c1_37 = arith.constant 1 : index
    %c1_38 = arith.constant 1 : index
    %c0_39 = arith.constant 0 : index
    %36 = vector.load %arg6[%c1_37, %c1_38, %c0_39] : memref<18x18x3xf32, #tpu.memory_space<vmem>>, vector<16x16x3xf32>
    %37 = vector.shape_cast %36 : vector<16x16x3xf32> to vector<256x3xf32>
    %38 = arith.truncf %37 : vector<256x3xf32> to vector<256x3xbf16>
    %c4 = arith.constant 4 : index
    %c0_40 = arith.constant 0 : index
    %c0_41 = arith.constant 0 : index
    %39 = vector.load %arg3[%c4, %c0_40, %c0_41] : memref<9x3x8xbf16, #tpu.memory_space<vmem>>, vector<1x3x8xbf16>
    %40 = vector.shape_cast %39 : vector<1x3x8xbf16> to vector<3x8xbf16>
    %cst_42 = arith.constant dense<0.000000e+00> : vector<256x8xf32>
    %41 = tpu.matmul %38, %40, %cst_42 {dimension_numbers = #tpu.dot_dimension_numbers<[1], [0], [0], [1], [0, 0, 1, 1], [], []>} : vector<256x3xbf16>, vector<3x8xbf16>, vector<256x8xf32> -> vector<256x8xf32>
    %42 = arith.addf %35, %41 : vector<256x8xf32>
    %c1_43 = arith.constant 1 : index
    %c2_44 = arith.constant 2 : index
    %c0_45 = arith.constant 0 : index
    %43 = vector.load %arg6[%c1_43, %c2_44, %c0_45] : memref<18x18x3xf32, #tpu.memory_space<vmem>>, vector<16x16x3xf32>
    %44 = vector.shape_cast %43 : vector<16x16x3xf32> to vector<256x3xf32>
    %45 = arith.truncf %44 : vector<256x3xf32> to vector<256x3xbf16>
    %c5 = arith.constant 5 : index
    %c0_46 = arith.constant 0 : index
    %c0_47 = arith.constant 0 : index
    %46 = vector.load %arg3[%c5, %c0_46, %c0_47] : memref<9x3x8xbf16, #tpu.memory_space<vmem>>, vector<1x3x8xbf16>
    %47 = vector.shape_cast %46 : vector<1x3x8xbf16> to vector<3x8xbf16>
    %cst_48 = arith.constant dense<0.000000e+00> : vector<256x8xf32>
    %48 = tpu.matmul %45, %47, %cst_48 {dimension_numbers = #tpu.dot_dimension_numbers<[1], [0], [0], [1], [0, 0, 1, 1], [], []>} : vector<256x3xbf16>, vector<3x8xbf16>, vector<256x8xf32> -> vector<256x8xf32>
    %49 = arith.addf %42, %48 : vector<256x8xf32>
    %c2_49 = arith.constant 2 : index
    %c0_50 = arith.constant 0 : index
    %c0_51 = arith.constant 0 : index
    %50 = vector.load %arg6[%c2_49, %c0_50, %c0_51] : memref<18x18x3xf32, #tpu.memory_space<vmem>>, vector<16x16x3xf32>
    %51 = vector.shape_cast %50 : vector<16x16x3xf32> to vector<256x3xf32>
    %52 = arith.truncf %51 : vector<256x3xf32> to vector<256x3xbf16>
    %c6 = arith.constant 6 : index
    %c0_52 = arith.constant 0 : index
    %c0_53 = arith.constant 0 : index
    %53 = vector.load %arg3[%c6, %c0_52, %c0_53] : memref<9x3x8xbf16, #tpu.memory_space<vmem>>, vector<1x3x8xbf16>
    %54 = vector.shape_cast %53 : vector<1x3x8xbf16> to vector<3x8xbf16>
    %cst_54 = arith.constant dense<0.000000e+00> : vector<256x8xf32>
    %55 = tpu.matmul %52, %54, %cst_54 {dimension_numbers = #tpu.dot_dimension_numbers<[1], [0], [0], [1], [0, 0, 1, 1], [], []>} : vector<256x3xbf16>, vector<3x8xbf16>, vector<256x8xf32> -> vector<256x8xf32>
    %56 = arith.addf %49, %55 : vector<256x8xf32>
    %c2_55 = arith.constant 2 : index
    %c1_56 = arith.constant 1 : index
    %c0_57 = arith.constant 0 : index
    %57 = vector.load %arg6[%c2_55, %c1_56, %c0_57] : memref<18x18x3xf32, #tpu.memory_space<vmem>>, vector<16x16x3xf32>
    %58 = vector.shape_cast %57 : vector<16x16x3xf32> to vector<256x3xf32>
    %59 = arith.truncf %58 : vector<256x3xf32> to vector<256x3xbf16>
    %c7 = arith.constant 7 : index
    %c0_58 = arith.constant 0 : index
    %c0_59 = arith.constant 0 : index
    %60 = vector.load %arg3[%c7, %c0_58, %c0_59] : memref<9x3x8xbf16, #tpu.memory_space<vmem>>, vector<1x3x8xbf16>
    %61 = vector.shape_cast %60 : vector<1x3x8xbf16> to vector<3x8xbf16>
    %cst_60 = arith.constant dense<0.000000e+00> : vector<256x8xf32>
    %62 = tpu.matmul %59, %61, %cst_60 {dimension_numbers = #tpu.dot_dimension_numbers<[1], [0], [0], [1], [0, 0, 1, 1], [], []>} : vector<256x3xbf16>, vector<3x8xbf16>, vector<256x8xf32> -> vector<256x8xf32>
    %63 = arith.addf %56, %62 : vector<256x8xf32>
    %c2_61 = arith.constant 2 : index
    %c2_62 = arith.constant 2 : index
    %c0_63 = arith.constant 0 : index
    %64 = vector.load %arg6[%c2_61, %c2_62, %c0_63] : memref<18x18x3xf32, #tpu.memory_space<vmem>>, vector<16x16x3xf32>
    %65 = vector.shape_cast %64 : vector<16x16x3xf32> to vector<256x3xf32>
    %66 = arith.truncf %65 : vector<256x3xf32> to vector<256x3xbf16>
    %c8 = arith.constant 8 : index
    %c0_64 = arith.constant 0 : index
    %c0_65 = arith.constant 0 : index
    %67 = vector.load %arg3[%c8, %c0_64, %c0_65] : memref<9x3x8xbf16, #tpu.memory_space<vmem>>, vector<1x3x8xbf16>
    %68 = vector.shape_cast %67 : vector<1x3x8xbf16> to vector<3x8xbf16>
    %cst_66 = arith.constant dense<0.000000e+00> : vector<256x8xf32>
    %69 = tpu.matmul %66, %68, %cst_66 {dimension_numbers = #tpu.dot_dimension_numbers<[1], [0], [0], [1], [0, 0, 1, 1], [], []>} : vector<256x3xbf16>, vector<3x8xbf16>, vector<256x8xf32> -> vector<256x8xf32>
    %70 = arith.addf %63, %69 : vector<256x8xf32>
    %71 = vector.broadcast %6 : vector<1x8xf32> to vector<256x8xf32>
    %72 = arith.addf %70, %71 : vector<256x8xf32>
    %cst_67 = arith.constant 0.000000e+00 : f32
    %73 = vector.broadcast %cst_67 : f32 to vector<256x8xf32>
    %74 = arith.maximumf %72, %73 : vector<256x8xf32>
    %75 = vector.shape_cast %74 : vector<256x8xf32> to vector<16x16x8xf32>
    %76 = arith.truncf %75 : vector<16x16x8xf32> to vector<16x16x8xbf16>
    %c0_68 = arith.constant 0 : index
    %c0_69 = arith.constant 0 : index
    %c0_70 = arith.constant 0 : index
    %c0_71 = arith.constant 0 : index
    %77 = vector.load %arg5[%c0_68, %c0_69, %c0_70, %c0_71] : memref<1x16x16x8xbf16, #tpu.memory_space<vmem>>, vector<1x16x16x8xbf16>
    %78 = vector.shape_cast %77 : vector<1x16x16x8xbf16> to vector<16x16x8xbf16>
    %79 = vector.shape_cast %76 : vector<16x16x8xbf16> to vector<1x16x16x8xbf16>
    tpu.vector_store %arg5[%c0_68, %c0_69, %c0_70, %c0_71], %79 {strides = array<i32>} : memref<1x16x16x8xbf16, #tpu.memory_space<vmem>>, vector<1x16x16x8xbf16>,
    return
  }
  func.func @transform_0(%arg0: i32, %arg1: i32) -> (i32, i32, i32, i32) {
    %c0_i32 = arith.constant 0 : i32
    %c0_i32_0 = arith.constant 0 : i32
    %c0_i32_1 = arith.constant 0 : i32
    %c0_i32_2 = arith.constant 0 : i32
    return %arg0, %c0_i32, %c0_i32_0, %c0_i32_1 : i32, i32, i32, i32
  }
  func.func @transform_1(%arg0: i32, %arg1: i32) -> (i32, i32, i32) {
    %c0_i32 = arith.constant 0 : i32
    %c0_i32_0 = arith.constant 0 : i32
    %c0_i32_1 = arith.constant 0 : i32
    return %c0_i32, %c0_i32_0, %arg1 : i32, i32, i32
  }
  func.func @transform_2(%arg0: i32, %arg1: i32) -> (i32, i32) {
    %c0_i32 = arith.constant 0 : i32
    %c0_i32_0 = arith.constant 0 : i32
    return %c0_i32, %arg1 : i32, i32
  }
  func.func @transform_3(%arg0: i32, %arg1: i32) -> (i32, i32, i32, i32) {
    %c0_i32 = arith.constant 0 : i32
    %c0_i32_0 = arith.constant 0 : i32
    %c0_i32_1 = arith.constant 0 : i32
    return %arg0, %c0_i32, %c0_i32_0, %arg1 : i32, i32, i32, i32
  }
}

</mosaic_0001>

<bundles_post_ra>
// kernel: tpu_custom_call.1
= control target key start
LH: loop header
LB: loop body
LE: loop exit
PB: predicated region body
PF: predicated region fallthrough
CT: control target
= control target key end

     0   :  { %s4143_s12 = smov 0   ;;  %s4145_s13 = smov 0   ;;  %s5292_s0 = inlined_call_operand.vmem [shape: bf16[2,16,16,3], index: 0, kind: input, shape index: {}]   ;;  %s5293_s1 = inlined_call_operand.vmem [shape: bf16[9,3,8], index: 1, kind: input, shape index: {}]   ;;  %s5294_s2 = inlined_call_operand.vmem [shape: f32[1,8], index: 2, kind: input, shape index: {}]   ;;  %s5295_s3 = inlined_call_operand.vmem [shape: bf16[2,16,16,8], index: 3, kind: output, shape index: {}]  }
   0x1   :  { %s4147_s14 = smov 0  }
   0x2 LB: > { %s25_s15 = sadd.s32 1, %s4115_s13  ;;  %p3305_p0 = scmp.ge.s32.totalorder %s4119_s14, 1  ;;  %s4119_s14 = sphi %s4147_s14, %s13_s14   ;;  %s4115_s13 = sphi %s4145_s13, %s5383_s13   ;;  %s4111_s12 = sphi %s4143_s12, %s5382_s12  }
   0x3   : > { %p27_p1 = scmp.ge.s32.totalorder %s25_s15, 2  ;;  %p168_p2 = scmp.lt.s32.totalorder %s4119_s14, 3 }
   0x5   : > { %s5385_s15 = smov (%p27_p1, %s25_s15), 0  ;;  %p169_p3 = pnand %p3305_p0, %p168_p2 }
   0x7   : > { %172 = sbr.rel (%p169_p3) target bundleno = 543 (0x21f), region = 32 }
   0xc   : > { %v4166_v0 = vld [vmem:[%s5293_s1 + $0x2] sm:$0x3]  ;;  %vm524_vm0 = vcmask 1040384   ;;  %vm525_vm1 = vcmask 1041408   ;;  %vm223_vm2 = vcmask 23552   ;;  %v4121_v1 = vmov 65535  }
   0xd   : > { %v526_v2 = vsel %vm524_vm0, 4294967295, %v4121_v1  ;;  %vm226_vm3 = vcmask 17408   ;;  %p202_p4 = scmp.lt.s32.totalorder %s4111_s12, 1  ;;  %v425_v3 = vld [vmem:[%s5293_s1] sm:$0x3]  ;;  %v4122_v5 = vmov 0.0  }
   0xe   : > { %v4172_v4 = vsel %vm525_vm1, %v526_v2, 0  ;;  %224 = vst.msk [vmem:[#allocation2] sm:$0xff] %vm223_vm2, %v4122_v5  ;;  %225 = vst.msk [vmem:[#allocation2 + $0x8] sm:$0xff] %vm223_vm2, %v4122_v5  ;;  %v3343_v6 = vld [vmem:[%s5293_s1 + $0x4] sm:$0x3]  ;;  %vm3161_vm4 = vcmask 60416  }
   0xf   : > { %227 = vst.msk [vmem:[#allocation2 + $0x10] sm:$0x3] %vm226_vm3, %v4122_v5  ;;  %230 = vst.msk [vmem:[#allocation2 + $0x28] sm:$0x3] %vm226_vm3, %v4122_v5  ;;  %v529_v7 = vand.u32 %v4166_v0, %v4172_v4  ;;  %s5387_s12 = smov (!%p202_p4, %s4111_s12), 1  ;;  %v4239_v8 = vand.u32 %v4172_v4, %v425_v3  ;;  %v4242_v9 = vand.u32 %v3343_v6, %v4172_v4 }
  0x10   : > { %228 = vst.msk [vmem:[#allocation2 + $0x18] sm:$0xff] %vm223_vm2, %v4122_v5  ;;  %229 = vst.msk [vmem:[#allocation2 + $0x20] sm:$0xff] %vm223_vm2, %v4122_v5  ;;  %s3497_s22 = sshll.u32 %s5387_s12, 7  ;;  %v3360_v58 = vld [vmem:[%s5293_s1 + $0x6] sm:$0x3] }
  0x11   : > { %231 = vst.msk [vmem:[#allocation2 + $0x30] sm:$0xff] %vm223_vm2, %v4122_v5  ;;  %232 = vst.msk [vmem:[#allocation2 + $0x38] sm:$0xff] %vm223_vm2, %v4122_v5  ;;  %3763 = vmatprep.subr.bf16.mxu0 %v529_v7  ;;  %4069 = vmatprep.subr.bf16.mxu1 %v529_v7  ;;  %s4250_s25 = scalar_lea.vmem %s5292_s0, %s3497_s22  ;;  %v3377_v59 = vld [vmem:[%s5293_s1 + $0x8] sm:$0x3]  ;;  %s5109_s19 = scalar_lea.vmem %s5295_s3, %s3497_s22 }
  0x12   : > { %233 = vst.msk [vmem:[#allocation2 + $0x40] sm:$0x3] %vm226_vm3, %v4122_v5  ;;  %236 = vst.msk [vmem:[#allocation2 + $0x58] sm:$0x3] %vm226_vm3, %v4122_v5  ;;  %3764 = vmatpush3.bf16.msra.mxu0 %v529_v7  ;;  %4070 = vmatpush3.bf16.msra.mxu1 %v529_v7  ;;  %v3532_v10 = vld [vmem:[%s4250_s25] sm:$0xff]   ;;  %v3601_v11 = vld [vmem:[%s4250_s25 + $0x38] sm:$0xff]  }
  0x13   : > { %234 = vst.msk [vmem:[#allocation2 + $0x48] sm:$0xff] %vm223_vm2, %v4122_v5  ;;  %235 = vst.msk [vmem:[#allocation2 + $0x50] sm:$0xff] %vm223_vm2, %v4122_v5  ;;  %3797 = vmatprep.subr.bf16.mxu1 %v4239_v8  ;;  %v3602_v12 = vld [vmem:[%s4250_s25 + $0x40] sm:$0xff]   ;;  %3831 = vmatprep.subr.bf16.mxu0 %v4242_v9  ;;  %v3533_v13 = vunpack.c.l.bf16 %v3532_v10  ;;  %v3534_v14 = vunpack.c.h.bf16 %v3532_v10  ;;  %v3561_v15 = vunpack.c.l.bf16 %v3601_v11  ;;  %v3562_v16 = vunpack.c.h.bf16 %v3601_v11  ;;  %v3595_v17 = vld [vmem:[%s4250_s25 + $0x8] sm:$0xff]  }
  0x14   : > { %237 = vst.msk [vmem:[#allocation2 + $0x60] sm:$0xff] %vm223_vm2, %v4122_v5  ;;  %238 = vst.msk [vmem:[#allocation2 + $0x68] sm:$0xff] %vm223_vm2, %v4122_v5  ;;  %v3596_v18 = vld [vmem:[%s4250_s25 + $0x10] sm:$0xff]   ;;  %v3603_v19 = vld [vmem:[%s4250_s25 + $0x48] sm:$0xff]   ;;  %v3565_v22 = vunpack.c.l.bf16 %v3602_v12  ;;  %v3566_v23 = vunpack.c.h.bf16 %v3602_v12  ;;  %v3537_v24 = vunpack.c.l.bf16 %v3595_v17  ;;  %v3538_v25 = vunpack.c.h.bf16 %v3595_v17 }
  0x15   : > { %239 = vst.msk [vmem:[#allocation2 + $0x70] sm:$0x3] %vm226_vm3, %v4122_v5  ;;  %242 = vst.msk [vmem:[#allocation2 + $0x88] sm:$0x3] %vm226_vm3, %v4122_v5  ;;  %v426_v20 = vld [vmem:[#allocation2 + $0x1] sm:$0xff]  ;;  %v3604_v26 = vld [vmem:[%s4250_s25 + $0x50] sm:$0xff]   ;;  %v3541_v28 = vunpack.c.l.bf16 %v3596_v18  ;;  %v3542_v29 = vunpack.c.h.bf16 %v3596_v18  ;;  %v3569_v30 = vunpack.c.l.bf16 %v3603_v19  ;;  %v3570_v34 = vunpack.c.h.bf16 %v3603_v19 }
  0x16   : > { %240 = vst.msk [vmem:[#allocation2 + $0x78] sm:$0xff] %vm223_vm2, %v4122_v5  ;;  %241 = vst.msk [vmem:[#allocation2 + $0x80] sm:$0xff] %vm223_vm2, %v4122_v5  ;;  %v427_v21 = vld [vmem:[#allocation2 + $0x9] sm:$0xff]  ;;  %v3597_v31 = vld [vmem:[%s4250_s25 + $0x18] sm:$0xff]   ;;  %v3573_v35 = vunpack.c.l.bf16 %v3604_v26  ;;  %v3574_v36 = vunpack.c.h.bf16 %v3604_v26 }
  0x17   : > { %243 = vst.msk [vmem:[#allocation2 + $0x90] sm:$0xff] %vm223_vm2, %v4122_v5  ;;  %244 = vst.msk [vmem:[#allocation2 + $0x98] sm:$0xff] %vm223_vm2, %v4122_v5  ;;  %v458_v27 = vpack.c.bf16 %v427_v21, %v426_v20  ;;  %v3598_v32 = vld [vmem:[%s4250_s25 + $0x20] sm:$0xff]   ;;  %v3605_v33 = vld [vmem:[%s4250_s25 + $0x58] sm:$0xff]   ;;  %v3545_v37 = vunpack.c.l.bf16 %v3597_v31  ;;  %v3546_v41 = vunpack.c.h.bf16 %v3597_v31 }
  0x18   : > { %245 = vst.msk [vmem:[#allocation2 + $0xa0] sm:$0x3] %vm226_vm3, %v4122_v5  ;;  %248 = vst.msk [vmem:[#allocation2 + $0xb8] sm:$0x3] %vm226_vm3, %v4122_v5  ;;  %v3606_v38 = vld [vmem:[%s4250_s25 + $0x60] sm:$0xff]   ;;  %v3599_v39 = vld [vmem:[%s4250_s25 + $0x28] sm:$0xff]   ;;  %v3549_v42 = vunpack.c.l.bf16 %v3598_v32  ;;  %v3550_v43 = vunpack.c.h.bf16 %v3598_v32  ;;  %v3577_v44 = vunpack.c.l.bf16 %v3605_v33  ;;  %v3578_v47 = vunpack.c.h.bf16 %v3605_v33 }
  0x19   : > { %246 = vst.msk [vmem:[#allocation2 + $0xa8] sm:$0xff] %vm223_vm2, %v4122_v5  ;;  %247 = vst.msk [vmem:[#allocation2 + $0xb0] sm:$0xff] %vm223_vm2, %v4122_v5  ;;  %v3600_v40 = vld [vmem:[%s4250_s25 + $0x30] sm:$0xff]   ;;  %3765 = vmatprep.mubr.msk.bf16.mxu0 %vm223_vm2, %v458_v27  ;;  %v3607_v45 = vld [vmem:[%s4250_s25 + $0x68] sm:$0xff]   ;;  %v3581_v48 = vunpack.c.l.bf16 %v3606_v38  ;;  %v3582_v49 = vunpack.c.h.bf16 %v3606_v38  ;;  %v3553_v50 = vunpack.c.l.bf16 %v3599_v39  ;;  %v3554_v51 = vunpack.c.h.bf16 %v3599_v39 }
  0x1a   : > { %249 = vst.msk [vmem:[#allocation2 + $0xc0] sm:$0xff] %vm223_vm2, %v4122_v5  ;;  %250 = vst.msk [vmem:[#allocation2 + $0xc8] sm:$0xff] %vm223_vm2, %v4122_v5  ;;  %v3608_v46 = vld [vmem:[%s4250_s25 + $0x70] sm:$0xff]   ;;  %v3557_v52 = vunpack.c.l.bf16 %v3600_v40  ;;  %v3558_v53 = vunpack.c.h.bf16 %v3600_v40  ;;  %v3585_v54 = vunpack.c.l.bf16 %v3607_v45  ;;  %v3586_v55 = vunpack.c.h.bf16 %v3607_v45  ;;  %v904_v40 = vld [vmem:[#allocation2 + $0x2] sm:$0xff] }
  0x1b   : > { %251 = vst.msk [vmem:[#allocation2 + $0xd0] sm:$0x3] %vm226_vm3, %v4122_v5  ;;  %254 = vst.msk [vmem:[#allocation2 + $0xe8] sm:$0x3] %vm226_vm3, %v4122_v5  ;;  %v3589_v56 = vunpack.c.l.bf16 %v3608_v46  ;;  %v3590_v57 = vunpack.c.h.bf16 %v3608_v46  ;;  %v377_v45 = vld [vmem:[#allocation2] sm:$0xff]  ;;  %v378_v46 = vld [vmem:[#allocation2 + $0x8] sm:$0xff] }
  0x1c   : > { %252 = vst.msk [vmem:[#allocation2 + $0xd8] sm:$0xff] %vm223_vm2, %v4122_v5  ;;  %253 = vst.msk [vmem:[#allocation2 + $0xe0] sm:$0xff] %vm223_vm2, %v4122_v5 }
  0x1d   : > { %255 = vst.msk [vmem:[#allocation2 + $0xf0] sm:$0xff] %vm223_vm2, %v4122_v5  ;;  %256 = vst.msk [vmem:[#allocation2 + $0xf8] sm:$0xff] %vm223_vm2, %v4122_v5 }
  0x1e   : > { %257 = vst.msk [vmem:[#allocation2 + $0x100] sm:$0x3] %vm226_vm3, %v4122_v5  ;;  %260 = vst.msk [vmem:[#allocation2 + $0x118] sm:$0x3] %vm226_vm3, %v4122_v5 }
  0x1f   : > { %258 = vst.msk [vmem:[#allocation2 + $0x108] sm:$0xff] %vm223_vm2, %v4122_v5  ;;  %259 = vst.msk [vmem:[#allocation2 + $0x110] sm:$0xff] %vm223_vm2, %v4122_v5 }
  0x20   : > { %261 = vst.msk [vmem:[#allocation2 + $0x120] sm:$0xff] %vm223_vm2, %v4122_v5  ;;  %262 = vst.msk [vmem:[#allocation2 + $0x128] sm:$0xff] %vm223_vm2, %v4122_v5 }
  0x21   : > { %263 = vst.msk [vmem:[#allocation2 + $0x130] sm:$0x3] %vm226_vm3, %v4122_v5  ;;  %266 = vst.msk [vmem:[#allocation2 + $0x148] sm:$0x3] %vm226_vm3, %v4122_v5 }
  0x22   : > { %264 = vst.msk [vmem:[#allocation2 + $0x138] sm:$0xff] %vm223_vm2, %v4122_v5  ;;  %265 = vst.msk [vmem:[#allocation2 + $0x140] sm:$0xff] %vm223_vm2, %v4122_v5 }
  0x23   : > { %267 = vst.msk [vmem:[#allocation2 + $0x150] sm:$0xff] %vm223_vm2, %v4122_v5  ;;  %268 = vst.msk [vmem:[#allocation2 + $0x158] sm:$0xff] %vm223_vm2, %v4122_v5 }
  0x24   : > { %269 = vst.msk [vmem:[#allocation2 + $0x160] sm:$0x3] %vm226_vm3, %v4122_v5  ;;  %272 = vst.msk [vmem:[#allocation2 + $0x178] sm:$0x3] %vm226_vm3, %v4122_v5 }
  0x25   : > { %270 = vst.msk [vmem:[#allocation2 + $0x168] sm:$0xff] %vm223_vm2, %v4122_v5  ;;  %271 = vst.msk [vmem:[#allocation2 + $0x170] sm:$0xff] %vm223_vm2, %v4122_v5 }
  0x26   : > { %273 = vst.msk [vmem:[#allocation2 + $0x180] sm:$0xff] %vm223_vm2, %v4122_v5  ;;  %274 = vst.msk [vmem:[#allocation2 + $0x188] sm:$0xff] %vm223_vm2, %v4122_v5 }
  0x27   : > { %275 = vst.msk [vmem:[#allocation2 + $0x190] sm:$0x3] %vm226_vm3, %v4122_v5  ;;  %278 = vst.msk [vmem:[#allocation2 + $0x1a8] sm:$0x3] %vm226_vm3, %v4122_v5 }
  0x28   : > { %276 = vst.msk [vmem:[#allocation2 + $0x198] sm:$0xff] %vm223_vm2, %v4122_v5  ;;  %277 = vst.msk [vmem:[#allocation2 + $0x1a0] sm:$0xff] %vm223_vm2, %v4122_v5 }
  0x29   : > { %344 = vst.msk [vmem:[#allocation2 + $0x19] sm:$0xff] %vm223_vm2, %v3533_v13  ;;  %345 = vst.msk [vmem:[#allocation2 + $0x21] sm:$0xff] %vm223_vm2, %v3534_v14  ;;  %v4317_v13 = vand.u32 %v3360_v58, %v4172_v4  ;;  %v4320_v14 = vand.u32 %v3377_v59, %v4172_v4 }
  0x2a   : > { %358 = vst.msk [vmem:[#allocation2 + $0xc1] sm:$0xff] %vm223_vm2, %v3561_v15  ;;  %359 = vst.msk [vmem:[#allocation2 + $0xc9] sm:$0xff] %vm223_vm2, %v3562_v16 }
  0x2b   : > { %360 = vst.msk [vmem:[#allocation2 + $0xd9] sm:$0xff] %vm223_vm2, %v3565_v22  ;;  %361 = vst.msk [vmem:[#allocation2 + $0xe1] sm:$0xff] %vm223_vm2, %v3566_v23 }
  0x2c   : > { %346 = vst.msk [vmem:[#allocation2 + $0x31] sm:$0xff] %vm223_vm2, %v3537_v24  ;;  %347 = vst.msk [vmem:[#allocation2 + $0x39] sm:$0xff] %vm223_vm2, %v3538_v25 }
  0x2d   : > { %348 = vst.msk [vmem:[#allocation2 + $0x49] sm:$0xff] %vm223_vm2, %v3541_v28  ;;  %349 = vst.msk [vmem:[#allocation2 + $0x51] sm:$0xff] %vm223_vm2, %v3542_v29 }
  0x2e   : > { %362 = vst.msk [vmem:[#allocation2 + $0xf1] sm:$0xff] %vm223_vm2, %v3569_v30  ;;  %363 = vst.msk [vmem:[#allocation2 + $0xf9] sm:$0xff] %vm223_vm2, %v3570_v34 }
  0x2f   : > { %364 = vst.msk [vmem:[#allocation2 + $0x109] sm:$0xff] %vm223_vm2, %v3573_v35  ;;  %365 = vst.msk [vmem:[#allocation2 + $0x111] sm:$0xff] %vm223_vm2, %v3574_v36 }
  0x30   : > { %350 = vst.msk [vmem:[#allocation2 + $0x61] sm:$0xff] %vm223_vm2, %v3545_v37  ;;  %351 = vst.msk [vmem:[#allocation2 + $0x69] sm:$0xff] %vm223_vm2, %v3546_v41  ;;  %v428_v60 = vld [vmem:[#allocation2 + $0x19] sm:$0xff]  ;;  %v429_v61 = vld [vmem:[#allocation2 + $0x21] sm:$0xff] }
  0x31   : > { %352 = vst.msk [vmem:[#allocation2 + $0x79] sm:$0xff] %vm223_vm2, %v3549_v42  ;;  %353 = vst.msk [vmem:[#allocation2 + $0x81] sm:$0xff] %vm223_vm2, %v3550_v43  ;;  %v442_v62 = vld [vmem:[#allocation2 + $0xc1] sm:$0xff]  ;;  %v4306_v63 = vpack.c.bf16 %v429_v61, %v428_v60  ;;  %v443_v0 = vld [vmem:[#allocation2 + $0xc9] sm:$0xff] }
  0x32   : > { %366 = vst.msk [vmem:[#allocation2 + $0x121] sm:$0xff] %vm223_vm2, %v3577_v44  ;;  %367 = vst.msk [vmem:[#allocation2 + $0x129] sm:$0xff] %vm223_vm2, %v3578_v47  ;;  %v444_v1 = vld [vmem:[#allocation2 + $0xd9] sm:$0xff]  ;;  %v445_v2 = vld [vmem:[#allocation2 + $0xe1] sm:$0xff]  ;;  %v4308_v3 = vpack.c.bf16 %v443_v0, %v442_v62 }
  0x33   : > { %368 = vst.msk [vmem:[#allocation2 + $0x139] sm:$0xff] %vm223_vm2, %v3581_v48  ;;  %369 = vst.msk [vmem:[#allocation2 + $0x141] sm:$0xff] %vm223_vm2, %v3582_v49  ;;  %v4310_v5 = vpack.c.bf16 %v445_v2, %v444_v1  ;;  %v430_v6 = vld [vmem:[#allocation2 + $0x31] sm:$0xff]  ;;  %v431_v7 = vld [vmem:[#allocation2 + $0x39] sm:$0xff]  ;;  %3766 = vmatmul.mubr.msk.bf16.vlgmr.msra.gmra.mxu0 %vm223_vm2, %v4306_v63  ;;  %v409_v49 = vpack.c.bf16 %v378_v46, %v377_v45 }
  0x34   : > { %354 = vst.msk [vmem:[#allocation2 + $0x91] sm:$0xff] %vm223_vm2, %v3553_v50  ;;  %355 = vst.msk [vmem:[#allocation2 + $0x99] sm:$0xff] %vm223_vm2, %v3554_v51  ;;  %v4314_v10 = vpack.c.bf16 %v431_v7, %v430_v6  ;;  %3781 = vmatprep.mubr.msk.bf16.mxu1 %vm223_vm2, %v4308_v3  ;;  %3832 = vmatpush3.bf16.msra.mxu0 %v4242_v9  ;;  %v432_v15 = vld [vmem:[#allocation2 + $0x49] sm:$0xff]  ;;  %v433_v16 = vld [vmem:[#allocation2 + $0x51] sm:$0xff] }
  0x35   : > { %356 = vst.msk [vmem:[#allocation2 + $0xa9] sm:$0xff] %vm223_vm2, %v3557_v52  ;;  %357 = vst.msk [vmem:[#allocation2 + $0xb1] sm:$0xff] %vm223_vm2, %v3558_v53  ;;  %v446_v11 = vld [vmem:[#allocation2 + $0xf1] sm:$0xff]  ;;  %v447_v12 = vld [vmem:[#allocation2 + $0xf9] sm:$0xff]  ;;  %3782 = vmatmul.mubr.msk.bf16.vlgmr.msra.gmra.mxu1 %vm223_vm2, %v4310_v5  ;;  %v4334_v9 = vpack.c.bf16 %v433_v16, %v432_v15  ;;  %3899 = vmatprep.subr.bf16.mxu0 %v4320_v14 }
  0x36   : > { %370 = vst.msk [vmem:[#allocation2 + $0x151] sm:$0xff] %vm223_vm2, %v3585_v54  ;;  %371 = vst.msk [vmem:[#allocation2 + $0x159] sm:$0xff] %vm223_vm2, %v3586_v55  ;;  %v4325_v17 = vpack.c.bf16 %v447_v12, %v446_v11  ;;  %3769 = vmatprep.mubr.msk.bf16.mxu0 %vm223_vm2, %v4314_v10  ;;  %3798 = vmatpush3.bf16.msra.mxu1 %v4239_v8  ;;  %v448_v20 = vld [vmem:[#allocation2 + $0x109] sm:$0xff]  ;;  %v449_v21 = vld [vmem:[#allocation2 + $0x111] sm:$0xff] }
  0x37   : > { %372 = vst.msk [vmem:[#allocation2 + $0x169] sm:$0xff] %vm223_vm2, %v3589_v56  ;;  %373 = vst.msk [vmem:[#allocation2 + $0x171] sm:$0xff] %vm223_vm2, %v3590_v57  ;;  %v434_v18 = vld [vmem:[#allocation2 + $0x61] sm:$0xff]  ;;  %v435_v19 = vld [vmem:[#allocation2 + $0x69] sm:$0xff]  ;;  %3865 = vmatprep.subr.bf16.mxu1 %v4317_v13  ;;  %v4340_v25 = vpack.c.bf16 %v449_v21, %v448_v20 }
  0x38   : > { %3785 = vmatprep.mubr.msk.bf16.mxu1 %vm223_vm2, %v4325_v17  ;;  %v4338_v24 = vpack.c.bf16 %v435_v19, %v434_v18  ;;  %v436_v8 = vld [vmem:[#allocation2 + $0x79] sm:$0xff]  ;;  %v437_v27 = vld [vmem:[#allocation2 + $0x81] sm:$0xff]  ;;  %v905_v41 = vld [vmem:[#allocation2 + $0xa] sm:$0xff] }
  0x39   : > { %v450_v22 = vld [vmem:[#allocation2 + $0x121] sm:$0xff]  ;;  %v451_v23 = vld [vmem:[#allocation2 + $0x129] sm:$0xff]  ;;  %v4352_v32 = vpack.c.bf16 %v437_v27, %v436_v8  ;;  %v936_v47 = vpack.c.bf16 %v905_v41, %v904_v40  ;;  %v908_v52 = vld [vmem:[#allocation2 + $0x32] sm:$0xff] }
  0x3a   : > { %v4342_v26 = vpack.c.bf16 %v451_v23, %v450_v22  ;;  %v452_v30 = vld [vmem:[#allocation2 + $0x139] sm:$0xff]  ;;  %v453_v31 = vld [vmem:[#allocation2 + $0x141] sm:$0xff]  ;;  %v3411_v54 = vld [vmem:[%s5293_s1 + $0xc] sm:$0x3] }
  0x3b   : > { %3770 = vmatmul.mubr.msk.bf16.gmra.mxu0 %vm223_vm2, %v4334_v9  ;;  %v438_v28 = vld [vmem:[#allocation2 + $0x91] sm:$0xff]  ;;  %v439_v29 = vld [vmem:[#allocation2 + $0x99] sm:$0xff]  ;;  %v4356_v36 = vpack.c.bf16 %v453_v31, %v452_v30  ;;  %v907_v51 = vld [vmem:[#allocation2 + $0x22] sm:$0xff]  ;;  %v4392_v6 = vand.u32 %v3411_v54, %v4172_v4 }
  0x3c   : > { %3773 = vmatprep.mubr.msk.bf16.mxu0 %vm223_vm2, %v4338_v24  ;;  %v4354_v35 = vpack.c.bf16 %v439_v29, %v438_v28  ;;  %v440_v38 = vld [vmem:[#allocation2 + $0xa9] sm:$0xff]  ;;  %v441_v39 = vld [vmem:[#allocation2 + $0xb1] sm:$0xff]  ;;  %v906_v50 = vld [vmem:[#allocation2 + $0x1a] sm:$0xff] }
  0x3d   : > { %3786 = vmatmul.mubr.msk.bf16.gmra.mxu1 %vm223_vm2, %v4340_v25  ;;  %v454_v33 = vld [vmem:[#allocation2 + $0x151] sm:$0xff]  ;;  %v455_v34 = vld [vmem:[#allocation2 + $0x159] sm:$0xff]  ;;  %v4368_v44 = vpack.c.bf16 %v441_v39, %v440_v38  ;;  %v4382_v58 = vpack.c.bf16 %v907_v51, %v906_v50  ;;  %v3394_v1 = vld [vmem:[%s5293_s1 + $0xa] sm:$0x3] }
  0x3e   : > { %3789 = vmatprep.mubr.msk.bf16.mxu1 %vm223_vm2, %v4342_v26  ;;  %v4358_v37 = vpack.c.bf16 %v455_v34, %v454_v33  ;;  %v456_v42 = vld [vmem:[#allocation2 + $0x169] sm:$0xff]  ;;  %v457_v43 = vld [vmem:[#allocation2 + $0x171] sm:$0xff]  ;;  %v909_v53 = vld [vmem:[#allocation2 + $0x3a] sm:$0xff]  ;;  %v4401_v11 = vand.u32 %v3394_v1, %v4172_v4 }
  0x3f   : > { %v4370_v48 = vpack.c.bf16 %v457_v43, %v456_v42  ;;  %v379_v55 = vld [vmem:[#allocation2 + $0x18] sm:$0xff]  ;;  %v380_v56 = vld [vmem:[#allocation2 + $0x20] sm:$0xff]  ;;  %v381_v59 = vld [vmem:[#allocation2 + $0x30] sm:$0xff]  ;;  %v4384_v0 = vpack.c.bf16 %v909_v53, %v908_v52 }
  0x40   : > { %v3609_v57 = vld [vmem:[%s4250_s25 + $0x78] sm:$0xff]   ;;  %v4389_v2 = vpack.c.bf16 %v380_v56, %v379_v55  ;;  %v910_v12 = vld [vmem:[#allocation2 + $0x4a] sm:$0xff]  ;;  %v912_v16 = vld [vmem:[#allocation2 + $0x62] sm:$0xff] }
  0x41   : > { %v382_v60 = vld [vmem:[#allocation2 + $0x38] sm:$0xff]  ;;  %v3593_v61 = vunpack.c.l.bf16 %v3609_v57  ;;  %v3594_v62 = vunpack.c.h.bf16 %v3609_v57  ;;  %v913_v18 = vld [vmem:[#allocation2 + $0x6a] sm:$0xff]  ;;  %v385_v21 = vld [vmem:[#allocation2 + $0x60] sm:$0xff] }
  0x42   : > { %v4396_v7 = vpack.c.bf16 %v382_v60, %v381_v59  ;;  %v911_v15 = vld [vmem:[#allocation2 + $0x52] sm:$0xff]  ;;  %v383_v19 = vld [vmem:[#allocation2 + $0x48] sm:$0xff]  ;;  %v4415_v23 = vpack.c.bf16 %v913_v18, %v912_v16  ;;  %v917_v30 = vld [vmem:[#allocation2 + $0x9a] sm:$0xff] }
  0x43   : > { %3774 = vmatmul.mubr.msk.bf16.gmra.mxu0 %vm223_vm2, %v4352_v32  ;;  %374 = vst.msk [vmem:[#allocation2 + $0x181] sm:$0xff] %vm223_vm2, %v3593_v61  ;;  %375 = vst.msk [vmem:[#allocation2 + $0x189] sm:$0xff] %vm223_vm2, %v3594_v62  ;;  %v384_v20 = vld [vmem:[#allocation2 + $0x50] sm:$0xff]  ;;  %v386_v22 = vld [vmem:[#allocation2 + $0x68] sm:$0xff] }
  0x44   : > { %3777 = vmatprep.mubr.msk.bf16.mxu0 %vm223_vm2, %v4354_v35  ;;  %v4417_v8 = vpack.c.bf16 %v384_v20, %v383_v19  ;;  %v4419_v27 = vpack.c.bf16 %v386_v22, %v385_v21  ;;  %v915_v28 = vld [vmem:[#allocation2 + $0x82] sm:$0xff]  ;;  %v916_v29 = vld [vmem:[#allocation2 + $0x92] sm:$0xff]  ;;  %v918_v43 = vld [vmem:[#allocation2 + $0xaa] sm:$0xff] }
  0x45   : > { %3790 = vmatmul.mubr.msk.bf16.gmra.mxu1 %vm223_vm2, %v4356_v36  ;;  %v387_v31 = vld [vmem:[#allocation2 + $0x78] sm:$0xff]  ;;  %v388_v33 = vld [vmem:[#allocation2 + $0x80] sm:$0xff]  ;;  %v389_v38 = vld [vmem:[#allocation2 + $0x90] sm:$0xff]  ;;  %v4431_v40 = vpack.c.bf16 %v917_v30, %v916_v29 }
  0x46   : > { %3793 = vmatprep.mubr.msk.bf16.mxu1 %vm223_vm2, %v4358_v37  ;;  %v390_v39 = vld [vmem:[#allocation2 + $0x98] sm:$0xff]  ;;  %v4433_v41 = vpack.c.bf16 %v388_v33, %v387_v31  ;;  %v920_v46 = vld [vmem:[#allocation2 + $0xc2] sm:$0xff]  ;;  %v392_v50 = vld [vmem:[#allocation2 + $0xb0] sm:$0xff] }
  0x47   : > { %v4435_v42 = vpack.c.bf16 %v390_v39, %v389_v38  ;;  %v919_v45 = vld [vmem:[#allocation2 + $0xb2] sm:$0xff]  ;;  %v393_v52 = vld [vmem:[#allocation2 + $0xc0] sm:$0xff]  ;;  %v394_v53 = vld [vmem:[#allocation2 + $0xc8] sm:$0xff] }
  0x48   : > { %v4445_v51 = vpack.c.bf16 %v919_v45, %v918_v43  ;;  %v4451_v56 = vpack.c.bf16 %v394_v53, %v393_v52  ;;  %v922_v57 = vld [vmem:[#allocation2 + $0xda] sm:$0xff]  ;;  %v923_v59 = vld [vmem:[#allocation2 + $0xe2] sm:$0xff]  ;;  %v924_v60 = vld [vmem:[#allocation2 + $0xf2] sm:$0xff] }
  0x49   : > { %v925_v61 = vld [vmem:[#allocation2 + $0xfa] sm:$0xff]  ;;  %v926_v21 = vld [vmem:[#allocation2 + $0x10a] sm:$0xff]  ;;  %v927_v22 = vld [vmem:[#allocation2 + $0x112] sm:$0xff] }
  0x4a   : > { %v395_v62 = vld [vmem:[#allocation2 + $0xd8] sm:$0xff]  ;;  %v396_v1 = vld [vmem:[#allocation2 + $0xe0] sm:$0xff]  ;;  %v4463_v18 = vpack.c.bf16 %v925_v61, %v924_v60  ;;  %v399_v29 = vld [vmem:[#allocation2 + $0x108] sm:$0xff]  ;;  %v4477_v31 = vpack.c.bf16 %v927_v22, %v926_v21 }
  0x4b   : > { %3778 = vmatmul.mubr.msk.bf16.gmra.mxu0 %vm223_vm2, %v4368_v44  ;;  %v398_v16 = vld [vmem:[#allocation2 + $0xf8] sm:$0xff]  ;;  %v4465_v19 = vpack.c.bf16 %v396_v1, %v395_v62  ;;  %v400_v30 = vld [vmem:[#allocation2 + $0x110] sm:$0xff]  ;;  %v401_v33 = vld [vmem:[#allocation2 + $0x120] sm:$0xff] }
  0x4c   : > { %3833 = vmatprep.mubr.msk.bf16.mxu0 %vm223_vm2, %v936_v47  ;;  %v921_v47 = vld [vmem:[#allocation2 + $0xca] sm:$0xff]  ;;  %v4481_v43 = vpack.c.bf16 %v400_v30, %v399_v29  ;;  %v403_v52 = vld [vmem:[#allocation2 + $0x138] sm:$0xff]  ;;  %v404_v53 = vld [vmem:[#allocation2 + $0x140] sm:$0xff] }
  0x4d   : > { %3794 = vmatmul.mubr.msk.bf16.gmra.mxu1 %vm223_vm2, %v4370_v48  ;;  %v4447_v54 = vpack.c.bf16 %v921_v47, %v920_v46  ;;  %v402_v38 = vld [vmem:[#allocation2 + $0x128] sm:$0xff]  ;;  %v930_v46 = vld [vmem:[#allocation2 + $0x13a] sm:$0xff]  ;;  %v4497_v62 = vpack.c.bf16 %v404_v53, %v403_v52  ;;  %v408_v22 = vld [vmem:[#allocation2 + $0x170] sm:$0xff] }
  0x4e   : > { %3799 = vmatprep.mubr.msk.bf16.mxu1 %vm223_vm2, %v409_v49  ;;  %v391_v49 = vld [vmem:[#allocation2 + $0xa8] sm:$0xff]  ;;  %v4483_v45 = vpack.c.bf16 %v402_v38, %v401_v33  ;;  %v406_v60 = vld [vmem:[#allocation2 + $0x158] sm:$0xff]  ;;  %v3445_v29 = vld [vmem:[%s5293_s1 + $0x10] sm:$0x3] }
  0x4f   : > { %v4449_v55 = vpack.c.bf16 %v392_v50, %v391_v49  ;;  %v931_v47 = vld [vmem:[#allocation2 + $0x142] sm:$0xff]  ;;  %v932_v49 = vld [vmem:[#allocation2 + $0x152] sm:$0xff]  ;;  %v933_v50 = vld [vmem:[#allocation2 + $0x15a] sm:$0xff]  ;;  %v2768_v33 = vand.u32 %v3445_v29, %v4172_v4 }
  0x50   : > { %v4495_v61 = vpack.c.bf16 %v933_v50, %v932_v49  ;;  %v407_v21 = vld [vmem:[#allocation2 + $0x168] sm:$0xff]  ;;  %v2376_v49 = vld [vmem:[#allocation2 + $0x39] sm:$0xff] }
  0x51   : > { %v3428_v30 = vld [vmem:[%s5293_s1 + $0xe] sm:$0x3]  ;;  %v2379_v29 = vld [vmem:[#allocation2 + $0x61] sm:$0xff] }
  0x52   : > { %v1817_v38 = vld [vmem:[#allocation2 + $0x18a] sm:$0xff] }
  0x53   : > { %3834 = vmatmul.mubr.msk.bf16.vlgmr.msra.gmra.mxu0 %vm223_vm2, %v4382_v58 }
  0x54   : > { %3900 = vmatpush3.bf16.msra.mxu0 %v4320_v14  ;;  %3837 = vmatprep.mubr.msk.bf16.mxu0 %vm223_vm2, %v4384_v0  ;;  %v4412_v14 = vpack.c.bf16 %v911_v15, %v910_v12  ;;  %v4461_v12 = vpack.c.bf16 %v923_v59, %v922_v57  ;;  %v397_v15 = vld [vmem:[#allocation2 + $0xf0] sm:$0xff]  ;;  %v4493_v57 = vpack.c.bf16 %v931_v47, %v930_v46 }
  0x55   : > { %3800 = vmatmul.mubr.msk.bf16.vlgmr.msra.gmra.mxu1 %vm223_vm2, %v4389_v2  ;;  %3967 = vmatprep.subr.bf16.mxu0 %v4392_v6  ;;  %v4467_v20 = vpack.c.bf16 %v398_v16, %v397_v15  ;;  %v405_v59 = vld [vmem:[#allocation2 + $0x150] sm:$0xff] }
  0x56   : > { %3866 = vmatpush3.bf16.msra.mxu1 %v4317_v13  ;;  %3803 = vmatprep.mubr.msk.bf16.mxu1 %vm223_vm2, %v4396_v7  ;;  %v914_v13 = vld [vmem:[#allocation2 + $0x7a] sm:$0xff]  ;;  %v4499_v1 = vpack.c.bf16 %v406_v60, %v405_v59  ;;  %v934_v15 = vld [vmem:[#allocation2 + $0x16a] sm:$0xff]  ;;  %v935_v16 = vld [vmem:[#allocation2 + $0x172] sm:$0xff] }
  0x57   : > { %3933 = vmatprep.subr.bf16.mxu1 %v4401_v11  ;;  %v4429_v34 = vpack.c.bf16 %v915_v28, %v914_v13  ;;  %v928_v13 = vld [vmem:[#allocation2 + $0x122] sm:$0xff]  ;;  %v929_v28 = vld [vmem:[#allocation2 + $0x12a] sm:$0xff] }
  0x58   : > { %v4479_v39 = vpack.c.bf16 %v929_v28, %v928_v13  ;;  %v4509_v13 = vpack.c.bf16 %v935_v16, %v934_v15  ;;  %v4511_v28 = vpack.c.bf16 %v408_v22, %v407_v21  ;;  %v2375_v47 = vld [vmem:[#allocation2 + $0x31] sm:$0xff]  ;;  %v2377_v16 = vld [vmem:[#allocation2 + $0x49] sm:$0xff] }
  0x59   : > { %v2407_v59 = vpack.c.bf16 %v2376_v49, %v2375_v47  ;;  %v2378_v21 = vld [vmem:[#allocation2 + $0x51] sm:$0xff]  ;;  %v2384_v49 = vld [vmem:[#allocation2 + $0x99] sm:$0xff] }
  0x5a   : > { %v2383_v47 = vld [vmem:[#allocation2 + $0x91] sm:$0xff] }
  0x5b   : > { %3838 = vmatmul.mubr.msk.bf16.gmra.mxu0 %vm223_vm2, %v4412_v14 }
  0x5c   : > { %3841 = vmatprep.mubr.msk.bf16.mxu0 %vm223_vm2, %v4415_v23 }
  0x5d   : > { %3804 = vmatmul.mubr.msk.bf16.gmra.mxu1 %vm223_vm2, %v4417_v8 }
  0x5e   : > { %3807 = vmatprep.mubr.msk.bf16.mxu1 %vm223_vm2, %v4419_v27 }
  0x63   : > { %3842 = vmatmul.mubr.msk.bf16.gmra.mxu0 %vm223_vm2, %v4429_v34 }
  0x64   : > { %3845 = vmatprep.mubr.msk.bf16.mxu0 %vm223_vm2, %v4431_v40 }
  0x65   : > { %3808 = vmatmul.mubr.msk.bf16.gmra.mxu1 %vm223_vm2, %v4433_v41 }
  0x66   : > { %3811 = vmatprep.mubr.msk.bf16.mxu1 %vm223_vm2, %v4435_v42 }
  0x6b   : > { %3846 = vmatmul.mubr.msk.bf16.gmra.mxu0 %vm223_vm2, %v4445_v51 }
  0x6c   : > { %3849 = vmatprep.mubr.msk.bf16.mxu0 %vm223_vm2, %v4447_v54 }
  0x6d   : > { %3812 = vmatmul.mubr.msk.bf16.gmra.mxu1 %vm223_vm2, %v4449_v55 }
  0x6e   : > { %3815 = vmatprep.mubr.msk.bf16.mxu1 %vm223_vm2, %v4451_v56 }
  0x73   : > { %3850 = vmatmul.mubr.msk.bf16.gmra.mxu0 %vm223_vm2, %v4461_v12 }
  0x74   : > { %3853 = vmatprep.mubr.msk.bf16.mxu0 %vm223_vm2, %v4463_v18 }
  0x75   : > { %3816 = vmatmul.mubr.msk.bf16.gmra.mxu1 %vm223_vm2, %v4465_v19 }
  0x76   : > { %3819 = vmatprep.mubr.msk.bf16.mxu1 %vm223_vm2, %v4467_v20 }
  0x7b   : > { %3854 = vmatmul.mubr.msk.bf16.gmra.mxu0 %vm223_vm2, %v4477_v31 }
  0x7c   : > { %3857 = vmatprep.mubr.msk.bf16.mxu0 %vm223_vm2, %v4479_v39 }
  0x7d   : > { %3820 = vmatmul.mubr.msk.bf16.gmra.mxu1 %vm223_vm2, %v4481_v43 }
  0x7e   : > { %3823 = vmatprep.mubr.msk.bf16.mxu1 %vm223_vm2, %v4483_v45 }
  0x83   : > { %3858 = vmatmul.mubr.msk.bf16.gmra.mxu0 %vm223_vm2, %v4493_v57 }
  0x84   : > { %3861 = vmatprep.mubr.msk.bf16.mxu0 %vm223_vm2, %v4495_v61 }
  0x85   : > { %3824 = vmatmul.mubr.msk.bf16.gmra.mxu1 %vm223_vm2, %v4497_v62 }
  0x86   : > { %3827 = vmatprep.mubr.msk.bf16.mxu1 %vm223_vm2, %v4499_v1 }
  0x8b   : > { %3862 = vmatmul.mubr.msk.bf16.gmra.mxu0 %vm223_vm2, %v4509_v13 }
  0x8c   : > { %3901 = vmatprep.mubr.msk.bf16.mxu0 %vm223_vm2, %v4306_v63  ;;  %v2474_v63 = vand.u32 %v3428_v30, %v4172_v4  ;;  %v1522_v4 = vld [vmem:[#allocation2 + $0x181] sm:$0xff]  ;;  %v2380_v30 = vld [vmem:[#allocation2 + $0x69] sm:$0xff] }
  0x8d   : > { %3828 = vmatmul.mubr.msk.bf16.gmra.mxu1 %vm223_vm2, %v4511_v28 }
  0x8e   : > { %3867 = vmatprep.mubr.msk.bf16.mxu1 %vm223_vm2, %v4389_v2 }
  0x93   : > { %3902 = vmatmul.mubr.msk.bf16.vlgmr.msra.gmra.mxu0 %vm223_vm2, %v4314_v10  ;;  %v1229_v10 = vld [vmem:[#allocation2 + $0x188] sm:$0xff] }
  0x94   : > { %3968 = vmatpush3.bf16.msra.mxu0 %v4392_v6  ;;  %3905 = vmatprep.mubr.msk.bf16.mxu0 %vm223_vm2, %v4334_v9 }
  0x95   : > { %3868 = vmatmul.mubr.msk.bf16.vlgmr.msra.gmra.mxu1 %vm223_vm2, %v4396_v7  ;;  %4035 = vmatprep.subr.bf16.mxu0 %v2768_v33 }
  0x96   : > { %3934 = vmatpush3.bf16.msra.mxu1 %v4401_v11  ;;  %3871 = vmatprep.mubr.msk.bf16.mxu1 %vm223_vm2, %v4417_v8 }
  0x97   : > { %4001 = vmatprep.subr.bf16.mxu1 %v2474_v63 }
  0x9b   : > { %3906 = vmatmul.mubr.msk.bf16.gmra.mxu0 %vm223_vm2, %v4338_v24 }
  0x9c   : > { %3909 = vmatprep.mubr.msk.bf16.mxu0 %vm223_vm2, %v4352_v32 }
  0x9d   : > { %3872 = vmatmul.mubr.msk.bf16.gmra.mxu1 %vm223_vm2, %v4419_v27 }
  0x9e   : > { %3875 = vmatprep.mubr.msk.bf16.mxu1 %vm223_vm2, %v4433_v41 }
  0xa3   : > { %3910 = vmatmul.mubr.msk.bf16.gmra.mxu0 %vm223_vm2, %v4354_v35 }
  0xa4   : > { %3913 = vmatprep.mubr.msk.bf16.mxu0 %vm223_vm2, %v4368_v44 }
  0xa5   : > { %3876 = vmatmul.mubr.msk.bf16.gmra.mxu1 %vm223_vm2, %v4435_v42 }
  0xa6   : > { %3879 = vmatprep.mubr.msk.bf16.mxu1 %vm223_vm2, %v4449_v55 }
  0xab   : > { %3914 = vmatmul.mubr.msk.bf16.gmra.mxu0 %vm223_vm2, %v4308_v3  ;;  %v1523_v3 = vld [vmem:[#allocation2 + $0x189] sm:$0xff] }
  0xac   : > { %3917 = vmatprep.mubr.msk.bf16.mxu0 %vm223_vm2, %v4310_v5  ;;  %v1228_v5 = vld [vmem:[#allocation2 + $0x180] sm:$0xff] }
  0xad   : > { %3880 = vmatmul.mubr.msk.bf16.gmra.mxu1 %vm223_vm2, %v4451_v56  ;;  %v1245_v9 = vpack.c.bf16 %v1229_v10, %v1228_v5 }
  0xae   : > { %3883 = vmatprep.mubr.msk.bf16.mxu1 %vm223_vm2, %v4465_v19 }
  0xb3   : > { %3918 = vmatmul.mubr.msk.bf16.gmra.mxu0 %vm223_vm2, %v4325_v17  ;;  %v4587_v17 = vpack.c.bf16 %v1523_v3, %v1522_v4  ;;  %v2409_v4 = vpack.c.bf16 %v2380_v30, %v2379_v29  ;;  %v2411_v30 = vpack.c.bf16 %v2384_v49, %v2383_v47  ;;  %v2388_v47 = vld [vmem:[#allocation2 + $0xc9] sm:$0xff] }
  0xb4   : > { %3921 = vmatprep.mubr.msk.bf16.mxu0 %vm223_vm2, %v4340_v25 }
  0xb5   : > { %3884 = vmatmul.mubr.msk.bf16.gmra.mxu1 %vm223_vm2, %v4467_v20 }
  0xb6   : > { %3887 = vmatprep.mubr.msk.bf16.mxu1 %vm223_vm2, %v4481_v43 }
  0xbb   : > { %3922 = vmatmul.mubr.msk.bf16.gmra.mxu0 %vm223_vm2, %v4342_v26 }
  0xbc   : > { %3925 = vmatprep.mubr.msk.bf16.mxu0 %vm223_vm2, %v4356_v36 }
  0xbd   : > { %3888 = vmatmul.mubr.msk.bf16.gmra.mxu1 %vm223_vm2, %v4483_v45 }
  0xbe   : > { %3891 = vmatprep.mubr.msk.bf16.mxu1 %vm223_vm2, %v4497_v62 }
  0xc3   : > { %3926 = vmatmul.mubr.msk.bf16.gmra.mxu0 %vm223_vm2, %v4358_v37 }
  0xc4   : > { %3929 = vmatprep.mubr.msk.bf16.mxu0 %vm223_vm2, %v4370_v48 }
  0xc5   : > { %3892 = vmatmul.mubr.msk.bf16.gmra.mxu1 %vm223_vm2, %v4499_v1 }
  0xc6   : > { %3895 = vmatprep.mubr.msk.bf16.mxu1 %vm223_vm2, %v4511_v28 }
  0xcb   : > { %3930 = vmatmul.mubr.msk.bf16.gmra.mxu0 %vm223_vm2, %v4587_v17 }
  0xcc   : > { %3969 = vmatprep.mubr.msk.bf16.mxu0 %vm223_vm2, %v4396_v7 }
  0xcd   : > { %3896 = vmatmul.mubr.msk.bf16.gmra.mxu1 %vm223_vm2, %v1245_v9 }
  0xce   : > { %3935 = vmatprep.mubr.msk.bf16.mxu1 %vm223_vm2, %v4382_v58 }
  0xd3   : > { %3970 = vmatmul.mubr.msk.bf16.vlgmr.msra.gmra.mxu0 %vm223_vm2, %v4417_v8 }
  0xd4   : > { %4036 = vmatpush3.bf16.msra.mxu0 %v2768_v33  ;;  %3973 = vmatprep.mubr.msk.bf16.mxu0 %vm223_vm2, %v4419_v27 }
  0xd5   : > { %3936 = vmatmul.mubr.msk.bf16.vlgmr.msra.gmra.mxu1 %vm223_vm2, %v4384_v0 }
  0xd6   : > { %4002 = vmatpush3.bf16.msra.mxu1 %v2474_v63  ;;  %3939 = vmatprep.mubr.msk.bf16.mxu1 %vm223_vm2, %v4412_v14  ;;  %v2408_v63 = vpack.c.bf16 %v2378_v21, %v2377_v16 }
  0xdb   : > { %3974 = vmatmul.mubr.msk.bf16.gmra.mxu0 %vm223_vm2, %v4433_v41 }
  0xdc   : > { %3977 = vmatprep.mubr.msk.bf16.mxu0 %vm223_vm2, %v4435_v42  ;;  %v2111_v42 = vld [vmem:[#allocation2 + $0x198] sm:$0xff] }
  0xdd   : > { %3940 = vmatmul.mubr.msk.bf16.gmra.mxu1 %vm223_vm2, %v4415_v23 }
  0xde   : > { %3943 = vmatprep.mubr.msk.bf16.mxu1 %vm223_vm2, %v4429_v34 }
  0xe3   : > { %3978 = vmatmul.mubr.msk.bf16.gmra.mxu0 %vm223_vm2, %v4449_v55  ;;  %v2112_v55 = vld [vmem:[#allocation2 + $0x1a0] sm:$0xff] }
  0xe4   : > { %3981 = vmatprep.mubr.msk.bf16.mxu0 %vm223_vm2, %v4451_v56  ;;  %v2128_v46 = vpack.c.bf16 %v2112_v55, %v2111_v42  ;;  %v2381_v55 = vld [vmem:[#allocation2 + $0x79] sm:$0xff] }
  0xe5   : > { %3944 = vmatmul.mubr.msk.bf16.gmra.mxu1 %vm223_vm2, %v4431_v40 }
  0xe6   : > { %3947 = vmatprep.mubr.msk.bf16.mxu1 %vm223_vm2, %v4445_v51 }
  0xeb   : > { %3982 = vmatmul.mubr.msk.bf16.gmra.mxu0 %vm223_vm2, %v4465_v19 }
  0xec   : > { %3985 = vmatprep.mubr.msk.bf16.mxu0 %vm223_vm2, %v4467_v20  ;;  %v1816_v20 = vld [vmem:[#allocation2 + $0x182] sm:$0xff] }
  0xed   : > { %3948 = vmatmul.mubr.msk.bf16.gmra.mxu1 %vm223_vm2, %v4447_v54  ;;  %v4697_v53 = vpack.c.bf16 %v1817_v38, %v1816_v20  ;;  %v2382_v20 = vld [vmem:[#allocation2 + $0x81] sm:$0xff] }
  0xee   : > { %3951 = vmatprep.mubr.msk.bf16.mxu1 %vm223_vm2, %v4461_v12  ;;  %v2410_v21 = vpack.c.bf16 %v2382_v20, %v2381_v55  ;;  %v2386_v55 = vld [vmem:[#allocation2 + $0xb1] sm:$0xff] }
  0xf3   : > { %v4628_v24 = vpop.f32.mrf.mxu0  ;;  %3986 = vmatmul.mubr.msk.bf16.gmra.mxu0 %vm223_vm2, %v4481_v43 }
  0xf4   : > { %3989 = vmatprep.mubr.msk.bf16.mxu0 %vm223_vm2, %v4483_v45 }
  0xf5   : > { %v4634_v25 = vpop.f32.mrf.mxu1  ;;  %3952 = vmatmul.mubr.msk.bf16.gmra.mxu1 %vm223_vm2, %v4463_v18  ;;  %v4638_v26 = vpop.f32.mrf.mxu0 }
  0xf6   : > { %3955 = vmatprep.mubr.msk.bf16.mxu1 %vm223_vm2, %v4477_v31 }
  0xf7   : > { %v4642_v32 = vpop.f32.mrf.mxu1  ;;  %v4644_v35 = vpop.f32.mrf.mxu0 }
  0xf9   : > { %v4646_v36 = vpop.f32.mrf.mxu1  ;;  %v4648_v37 = vpop.f32.mrf.mxu0 }
  0xfb   : > { %v4650_v44 = vpop.f32.mrf.mxu1  ;;  %v4652_v48 = vpop.f32.mrf.mxu0  ;;  %3990 = vmatmul.mubr.msk.bf16.gmra.mxu0 %vm223_vm2, %v4497_v62 }
  0xfc   : > { %3993 = vmatprep.mubr.msk.bf16.mxu0 %vm223_vm2, %v4499_v1 }
  0xfd   : > { %v4658_v58 = vpop.f32.mrf.mxu1  ;;  %3956 = vmatmul.mubr.msk.bf16.gmra.mxu1 %vm223_vm2, %v4479_v39  ;;  %v4662_v2 = vpop.f32.mrf.mxu0 }
  0xfe   : > { %3959 = vmatprep.mubr.msk.bf16.mxu1 %vm223_vm2, %v4493_v57 }
  0xff   : > { %v4666_v6 = vpop.f32.mrf.mxu1  ;;  %v4668_v7 = vpop.f32.mrf.mxu0 }
 0x101   : > { %v4670_v11 = vpop.f32.mrf.mxu1  ;;  %v4672_v8 = vpop.f32.mrf.mxu0 }
 0x103   : > { %v4674_v27 = vpop.f32.mrf.mxu1  ;;  %v4676_v41 = vpop.f32.mrf.mxu0  ;;  %3994 = vmatmul.mubr.msk.bf16.gmra.mxu0 %vm223_vm2, %v4511_v28 }
 0x104   : > { %3997 = vmatprep.mubr.msk.bf16.mxu0 %vm223_vm2, %v1245_v9 }
 0x105   : > { %v4681_v56 = vpop.f32.mrf.mxu1  ;;  %3960 = vmatmul.mubr.msk.bf16.gmra.mxu1 %vm223_vm2, %v4495_v61  ;;  %v4685_v19 = vpop.f32.mrf.mxu0 }
 0x106   : > { %3963 = vmatprep.mubr.msk.bf16.mxu1 %vm223_vm2, %v4509_v13 }
 0x107   : > { %v4689_v43 = vpop.f32.mrf.mxu1  ;;  %v4691_v45 = vpop.f32.mrf.mxu0 }
 0x109   : > { %v4693_v50 = vpop.f32.mrf.mxu1  ;;  %v4695_v52 = vpop.f32.mrf.mxu0 }
 0x10b   : > { %v4699_v60 = vpop.f32.mrf.mxu1  ;;  %v4701_v62 = vpop.f32.mrf.mxu0  ;;  %3998 = vmatmul.mubr.msk.bf16.gmra.mxu0 %vm223_vm2, %v2128_v46 }
 0x10c   : > { %4037 = vmatprep.mubr.msk.bf16.mxu0 %vm223_vm2, %v4384_v0 }
 0x10d   : > { %v4706_v1 = vpop.f32.mrf.mxu1  ;;  %3964 = vmatmul.mubr.msk.bf16.gmra.mxu1 %vm223_vm2, %v4697_v53  ;;  %v4710_v15 = vpop.f32.mrf.mxu0 }
 0x10e   : > { %4003 = vmatprep.mubr.msk.bf16.mxu1 %vm223_vm2, %v2407_v59 }
 0x10f   : > { %v4713_v22 = vpop.f32.mrf.mxu1  ;;  %v4715_v28 = vpop.f32.mrf.mxu0 }
 0x111   : > { %v4717_v33 = vpop.f32.mrf.mxu1  ;;  %v4719_v0 = vpop.f32.mrf.mxu0 }
 0x113   : > { %v4721_v3 = vpop.f32.mrf.mxu1  ;;  %v3835_v5 = vpop.f32.mrf.mxu0  ;;  %4038 = vmatmul.mubr.msk.bf16.vlgmr.msra.gmra.mxu0 %vm223_vm2, %v4412_v14 }
 0x114   : > { %4041 = vmatprep.mubr.msk.bf16.mxu0 %vm223_vm2, %v4415_v23 }
 0x115   : > { %v3801_v10 = vpop.f32.mrf.mxu1  ;;  %4004 = vmatmul.mubr.msk.bf16.vlgmr.msra.gmra.mxu1 %vm223_vm2, %v2408_v63  ;;  %v1039_v9 = vpop.f32.mrf.mxu0 }
 0x116   : > { %v786_v42 = vadd.f32 %v3801_v10, %v4628_v24  ;;  %4007 = vmatprep.mubr.msk.bf16.mxu1 %vm223_vm2, %v2409_v4 }
 0x117   : > { %v777_v38 = vpop.f32.mrf.mxu1  ;;  %v3836_v46 = vpop.f32.mrf.mxu0 }
 0x118   : > { %v778_v59 = vadd.f32 %v777_v38, %v4638_v26  ;;  %v4731_v14 = vadd.f32 %v3835_v5, %v786_v42 }
 0x119   : > { %v3802_v16 = vpop.f32.mrf.mxu1  ;;  %v1042_v23 = vpop.f32.mrf.mxu0 }
 0x11a   : > { %v789_v29 = vadd.f32 %v3802_v16, %v4644_v35  ;;  %v4734_v63 = vadd.f32 %v1039_v9, %v778_v59  ;;  %v2385_v9 = vld [vmem:[#allocation2 + $0xa9] sm:$0xff] }
 0x11b   : > { %v780_v24 = vpop.f32.mrf.mxu1  ;;  %v3839_v4 = vpop.f32.mrf.mxu0  ;;  %4042 = vmatmul.mubr.msk.bf16.gmra.mxu0 %vm223_vm2, %v4429_v34  ;;  %v2412_v16 = vpack.c.bf16 %v2386_v55, %v2385_v9  ;;  %v2392_v55 = vld [vmem:[#allocation2 + $0xf9] sm:$0xff] }
 0x11c   : > { %v781_v10 = vadd.f32 %v780_v24, %v4648_v37  ;;  %4045 = vmatprep.mubr.msk.bf16.mxu0 %vm223_vm2, %v4431_v40  ;;  %v4741_v26 = vadd.f32 %v3836_v46, %v789_v29  ;;  %v2387_v37 = vld [vmem:[#allocation2 + $0xc1] sm:$0xff] }
 0x11d   : > { %v3805_v5 = vpop.f32.mrf.mxu1  ;;  %4008 = vmatmul.mubr.msk.bf16.gmra.mxu1 %vm223_vm2, %v2410_v21  ;;  %v1055_v42 = vpop.f32.mrf.mxu0 }
 0x11e   : > { %v802_v35 = vadd.f32 %v3805_v5, %v4652_v48  ;;  %4011 = vmatprep.mubr.msk.bf16.mxu1 %vm223_vm2, %v2411_v30  ;;  %v4746_v20 = vadd.f32 %v1042_v23, %v781_v10  ;;  %v2413_v48 = vpack.c.bf16 %v2388_v47, %v2387_v37  ;;  %v2389_v5 = vld [vmem:[#allocation2 + $0xd9] sm:$0xff] }
 0x11f   : > { %v793_v34 = vpop.f32.mrf.mxu1  ;;  %v3840_v38 = vpop.f32.mrf.mxu0 }
 0x120   : > { %v794_v40 = vadd.f32 %v793_v34, %v4662_v2  ;;  %v4749_v46 = vadd.f32 %v3839_v4, %v802_v35 }
 0x121   : > { %v3806_v49 = vpop.f32.mrf.mxu1  ;;  %v1058_v59 = vpop.f32.mrf.mxu0 }
 0x122   : > { %v805_v21 = vadd.f32 %v3806_v49, %v4668_v7  ;;  %v4752_v29 = vadd.f32 %v1055_v42, %v794_v40  ;;  %v2390_v42 = vld [vmem:[#allocation2 + $0xe1] sm:$0xff] }
 0x123   : > { %v796_v30 = vpop.f32.mrf.mxu1  ;;  %v3843_v24 = vpop.f32.mrf.mxu0  ;;  %4046 = vmatmul.mubr.msk.bf16.gmra.mxu0 %vm223_vm2, %v4445_v51  ;;  %v2414_v47 = vpack.c.bf16 %v2390_v42, %v2389_v5 }
 0x124   : > { %v797_v23 = vadd.f32 %v796_v30, %v4672_v8  ;;  %4049 = vmatprep.mubr.msk.bf16.mxu0 %vm223_vm2, %v4447_v54  ;;  %v4759_v2 = vadd.f32 %v3840_v38, %v805_v21  ;;  %v2391_v8 = vld [vmem:[#allocation2 + $0xf1] sm:$0xff] }
 0x125   : > { %v3809_v4 = vpop.f32.mrf.mxu1  ;;  %4012 = vmatmul.mubr.msk.bf16.gmra.mxu1 %vm223_vm2, %v2412_v16  ;;  %v1071_v10 = vpop.f32.mrf.mxu0 }
 0x126   : > { %v818_v7 = vadd.f32 %v3809_v4, %v4676_v41  ;;  %4015 = vmatprep.mubr.msk.bf16.mxu1 %vm223_vm2, %v2413_v48  ;;  %v4764_v35 = vadd.f32 %v1058_v59, %v797_v23  ;;  %v2415_v41 = vpack.c.bf16 %v2392_v55, %v2391_v8  ;;  %v2394_v23 = vld [vmem:[#allocation2 + $0x111] sm:$0xff] }
 0x127   : > { %v809_v51 = vpop.f32.mrf.mxu1  ;;  %v3844_v9 = vpop.f32.mrf.mxu0 }
 0x128   : > { %v810_v54 = vadd.f32 %v809_v51, %v4685_v19  ;;  %v4767_v34 = vadd.f32 %v3843_v24, %v818_v7  ;;  %v2393_v24 = vld [vmem:[#allocation2 + $0x109] sm:$0xff] }
 0x129   : > { %v3810_v38 = vpop.f32.mrf.mxu1  ;;  %v1074_v37 = vpop.f32.mrf.mxu0  ;;  %v2396_v7 = vld [vmem:[#allocation2 + $0x129] sm:$0xff] }
 0x12a   : > { %v821_v40 = vadd.f32 %v3810_v38, %v4691_v45  ;;  %v4770_v49 = vadd.f32 %v1071_v10, %v810_v54 }
 0x12b   : > { %v812_v16 = vpop.f32.mrf.mxu1  ;;  %v3847_v21 = vpop.f32.mrf.mxu0  ;;  %4050 = vmatmul.mubr.msk.bf16.gmra.mxu0 %vm223_vm2, %v4461_v12 }
 0x12c   : > { %v813_v59 = vadd.f32 %v812_v16, %v4695_v52  ;;  %4053 = vmatprep.mubr.msk.bf16.mxu0 %vm223_vm2, %v4463_v18  ;;  %v4777_v19 = vadd.f32 %v3844_v9, %v821_v40  ;;  %v2395_v52 = vld [vmem:[#allocation2 + $0x121] sm:$0xff]  ;;  %v2416_v9 = vpack.c.bf16 %v2394_v23, %v2393_v24 }
 0x12d   : > { %v3813_v48 = vpop.f32.mrf.mxu1  ;;  %4016 = vmatmul.mubr.msk.bf16.gmra.mxu1 %vm223_vm2, %v2414_v47  ;;  %v1087_v30 = vpop.f32.mrf.mxu0  ;;  %v2398_v16 = vld [vmem:[#allocation2 + $0x141] sm:$0xff] }
 0x12e   : > { %v834_v45 = vadd.f32 %v3813_v48, %v4701_v62  ;;  %4019 = vmatprep.mubr.msk.bf16.mxu1 %vm223_vm2, %v2415_v41  ;;  %v4782_v4 = vadd.f32 %v1074_v37, %v813_v59  ;;  %v2417_v62 = vpack.c.bf16 %v2396_v7, %v2395_v52  ;;  %v2397_v41 = vld [vmem:[#allocation2 + $0x139] sm:$0xff] }
 0x12f   : > { %v825_v12 = vpop.f32.mrf.mxu1  ;;  %v3848_v10 = vpop.f32.mrf.mxu0  ;;  %v2400_v48 = vld [vmem:[#allocation2 + $0x159] sm:$0xff]  ;;  %v2418_v23 = vpack.c.bf16 %v2398_v16, %v2397_v41 }
 0x130   : > { %v826_v18 = vadd.f32 %v825_v12, %v4710_v15  ;;  %v4785_v5 = vadd.f32 %v3847_v21, %v834_v45 }
 0x131   : > { %v3814_v42 = vpop.f32.mrf.mxu1  ;;  %v1090_v51 = vpop.f32.mrf.mxu0 }
 0x132   : > { %v837_v8 = vadd.f32 %v3814_v42, %v4715_v28  ;;  %v4788_v55 = vadd.f32 %v1087_v30, %v826_v18 }
 0x133   : > { %v828_v54 = vpop.f32.mrf.mxu1  ;;  %v3851_v38 = vpop.f32.mrf.mxu0  ;;  %4054 = vmatmul.mubr.msk.bf16.gmra.mxu0 %vm223_vm2, %v4477_v31 }
 0x134   : > { %v829_v37 = vadd.f32 %v828_v54, %v4719_v0  ;;  %4057 = vmatprep.mubr.msk.bf16.mxu0 %vm223_vm2, %v4479_v39  ;;  %v4795_v15 = vadd.f32 %v3848_v10, %v837_v8  ;;  %v2399_v0 = vld [vmem:[#allocation2 + $0x151] sm:$0xff] }
 0x135   : > { %v3817_v47 = vpop.f32.mrf.mxu1  ;;  %4020 = vmatmul.mubr.msk.bf16.gmra.mxu1 %vm223_vm2, %v2416_v9  ;;  %v1103_v40 = vpop.f32.mrf.mxu0  ;;  %v2401_v9 = vld [vmem:[#allocation2 + $0x169] sm:$0xff]  ;;  %v2402_v8 = vld [vmem:[#allocation2 + $0x171] sm:$0xff] }
 0x136   : > { %v850_v28 = vadd.f32 %v3817_v47, %v4634_v25  ;;  %4023 = vmatprep.mubr.msk.bf16.mxu1 %vm223_vm2, %v2417_v62  ;;  %v4800_v21 = vadd.f32 %v1090_v51, %v829_v37  ;;  %v2419_v25 = vpack.c.bf16 %v2400_v48, %v2399_v0  ;;  %v2420_v47 = vpack.c.bf16 %v2402_v8, %v2401_v9 }
 0x137   : > { %v841_v31 = vpop.f32.mrf.mxu1  ;;  %v3852_v59 = vpop.f32.mrf.mxu0 }
 0x138   : > { %v842_v39 = vadd.f32 %v841_v31, %v4642_v32  ;;  %v4803_v30 = vadd.f32 %v3851_v38, %v850_v28  ;;  %v2700_v31 = vld [vmem:[#allocation2 + $0x1a2] sm:$0xff] }
 0x139   : > { %v3818_v45 = vpop.f32.mrf.mxu1  ;;  %v1106_v24 = vpop.f32.mrf.mxu0 }
 0x13a   : > { %v853_v12 = vadd.f32 %v3818_v45, %v4646_v36  ;;  %v4806_v10 = vadd.f32 %v1103_v40, %v842_v39  ;;  %v2405_v39 = vld [vmem:[#allocation2 + $0x199] sm:$0xff] }
 0x13b   : > { %v844_v52 = vpop.f32.mrf.mxu1  ;;  %v3855_v7 = vpop.f32.mrf.mxu0  ;;  %4058 = vmatmul.mubr.msk.bf16.gmra.mxu0 %vm223_vm2, %v4493_v57 }
 0x13c   : > { %v845_v18 = vadd.f32 %v844_v52, %v4650_v44  ;;  %4061 = vmatprep.mubr.msk.bf16.mxu0 %vm223_vm2, %v4495_v61  ;;  %v4813_v32 = vadd.f32 %v3852_v59, %v853_v12 }
 0x13d   : > { %v3821_v42 = vpop.f32.mrf.mxu1  ;;  %4024 = vmatmul.mubr.msk.bf16.gmra.mxu1 %vm223_vm2, %v2418_v23  ;;  %v1119_v51 = vpop.f32.mrf.mxu0 }
 0x13e   : > { %v866_v36 = vadd.f32 %v3821_v42, %v4658_v58  ;;  %4027 = vmatprep.mubr.msk.bf16.mxu1 %vm223_vm2, %v2419_v25  ;;  %v4818_v62 = vadd.f32 %v1106_v24, %v845_v18 }
 0x13f   : > { %v857_v57 = vpop.f32.mrf.mxu1  ;;  %v3856_v54 = vpop.f32.mrf.mxu0 }
 0x140   : > { %v858_v44 = vadd.f32 %v857_v57, %v4666_v6  ;;  %v4821_v38 = vadd.f32 %v3855_v7, %v866_v36  ;;  %v2699_v6 = vld [vmem:[#allocation2 + $0x19a] sm:$0xff] }
 0x141   : > { %v3822_v61 = vpop.f32.mrf.mxu1  ;;  %v1122_v37 = vpop.f32.mrf.mxu0 }
 0x142   : > { %v869_v40 = vadd.f32 %v3822_v61, %v4670_v11  ;;  %v4824_v28 = vadd.f32 %v1119_v51, %v858_v44 }
 0x143   : > { %v860_v58 = vpop.f32.mrf.mxu1  ;;  %v3859_v41 = vpop.f32.mrf.mxu0  ;;  %4062 = vmatmul.mubr.msk.bf16.gmra.mxu0 %vm223_vm2, %v4509_v13  ;;  %v2406_v13 = vld [vmem:[#allocation2 + $0x1a1] sm:$0xff] }
 0x144   : > { %v861_v16 = vadd.f32 %v860_v58, %v4674_v27  ;;  %4065 = vmatprep.mubr.msk.bf16.mxu0 %vm223_vm2, %v4697_v53  ;;  %v4831_v59 = vadd.f32 %v3856_v54, %v869_v40  ;;  %v2716_v53 = vpack.c.bf16 %v2700_v31, %v2699_v6  ;;  %v2422_v7 = vpack.c.bf16 %v2406_v13, %v2405_v39 }
 0x145   : > { %v3825_v0 = vpop.f32.mrf.mxu1  ;;  %4028 = vmatmul.mubr.msk.bf16.gmra.mxu1 %vm223_vm2, %v2420_v47  ;;  %v1135_v11 = vpop.f32.mrf.mxu0 }
 0x146   : > { %v882_v48 = vadd.f32 %v3825_v0, %v4681_v56  ;;  %4031 = vmatprep.mubr.msk.bf16.mxu1 %vm223_vm2, %v4587_v17  ;;  %v4837_v45 = vadd.f32 %v1122_v37, %v861_v16 }
 0x147   : > { %v873_v27 = vpop.f32.mrf.mxu1  ;;  %v3860_v24 = vpop.f32.mrf.mxu0 }
 0x148   : > { %v874_v23 = vadd.f32 %v873_v27, %v4689_v43  ;;  %v4840_v12 = vadd.f32 %v3859_v41, %v882_v48 }
 0x149   : > { %v3826_v25 = vpop.f32.mrf.mxu1  ;;  %v1138_v52 = vpop.f32.mrf.mxu0 }
 0x14a   : > { %v885_v18 = vadd.f32 %v3826_v25, %v4693_v50  ;;  %v4843_v56 = vadd.f32 %v1135_v11, %v874_v23 }
 0x14b   : > { %v876_v42 = vpop.f32.mrf.mxu1  ;;  %v3863_v17 = vpop.f32.mrf.mxu0  ;;  %4066 = vmatmul.mubr.msk.bf16.gmra.mxu0 %vm223_vm2, %v2716_v53 }
 0x14c   : > { %v877_v51 = vadd.f32 %v876_v42, %v4699_v60  ;;  %v4847_v36 = vadd.f32 %v3860_v24, %v885_v18 }
 0x14d   : > { %v3829_v9 = vpop.f32.mrf.mxu1  ;;  %4032 = vmatmul.mubr.msk.bf16.gmra.mxu1 %vm223_vm2, %v2422_v7  ;;  %v1151_v43 = vpop.f32.mrf.mxu0 }
 0x14e   : > { %v898_v8 = vadd.f32 %v3829_v9, %v4706_v1  ;;  %v4851_v57 = vadd.f32 %v1138_v52, %v877_v51 }
 0x14f   : > { %v889_v54 = vpop.f32.mrf.mxu1  ;;  %v3864_v50 = vpop.f32.mrf.mxu0 }
 0x150   : > { %v890_v44 = vadd.f32 %v889_v54, %v4713_v22  ;;  %v4854_v61 = vadd.f32 %v3863_v17, %v898_v8 }
 0x151   : > { %v3830_v37 = vpop.f32.mrf.mxu1  ;;  %v1154_v47 = vpop.f32.mrf.mxu0 }
 0x152   : > { %v901_v60 = vadd.f32 %v3830_v37, %v4717_v33  ;;  %v4857_v40 = vadd.f32 %v1151_v43, %v890_v44 }
 0x153   : > { %v892_v58 = vpop.f32.mrf.mxu1  ;;  %v3903_v41 = vpop.f32.mrf.mxu0 }
 0x154   : > { %v893_v16 = vadd.f32 %v892_v58, %v4721_v3  ;;  %v4860_v6 = vadd.f32 %v3864_v50, %v901_v60 }
 0x155   : > { %v3869_v1 = vpop.f32.mrf.mxu1  ;;  %v1627_v31 = vpop.f32.mrf.mxu0 }
 0x156   : > { %v1462_v0 = vadd.f32 %v3869_v1, %v4731_v14  ;;  %v4863_v11 = vadd.f32 %v1154_v47, %v893_v16 }
 0x157   : > { %v1333_v22 = vpop.f32.mrf.mxu1  ;;  %v3904_v48 = vpop.f32.mrf.mxu0 }
 0x158   : > { %v1460_v39 = vadd.f32 %v1333_v22, %v4734_v63  ;;  %v4866_v13 = vadd.f32 %v3903_v41, %v1462_v0 }
 0x159   : > { %v3870_v33 = vpop.f32.mrf.mxu1  ;;  %v1630_v27 = vpop.f32.mrf.mxu0 }
 0x15a   : > { %v1463_v24 = vadd.f32 %v3870_v33, %v4741_v26  ;;  %v4869_v53 = vadd.f32 %v1627_v31, %v1460_v39 }
 0x15b   : > { %v1336_v3 = vpop.f32.mrf.mxu1  ;;  %v3907_v23 = vpop.f32.mrf.mxu0 }
 0x15c   : > { %v1461_v25 = vadd.f32 %v1336_v3, %v4746_v20  ;;  %v4872_v52 = vadd.f32 %v3904_v48, %v1463_v24 }
 0x15d   : > { %v3873_v14 = vpop.f32.mrf.mxu1  ;;  %v1643_v7 = vpop.f32.mrf.mxu0 }
 0x15e   : > { %v1466_v18 = vadd.f32 %v3873_v14, %v4749_v46  ;;  %v4875_v42 = vadd.f32 %v1630_v27, %v1461_v25 }
 0x15f   : > { %v1349_v63 = vpop.f32.mrf.mxu1  ;;  %v3908_v17 = vpop.f32.mrf.mxu0 }
 0x160   : > { %v1464_v51 = vadd.f32 %v1349_v63, %v4752_v29  ;;  %v4878_v9 = vadd.f32 %v3907_v23, %v1466_v18 }
 0x161   : > { %v3874_v26 = vpop.f32.mrf.mxu1  ;;  %v1646_v43 = vpop.f32.mrf.mxu0 }
 0x162   : > { %v1467_v8 = vadd.f32 %v3874_v26, %v4759_v2  ;;  %v4881_v54 = vadd.f32 %v1643_v7, %v1464_v51 }
 0x163   : > { %v1352_v20 = vpop.f32.mrf.mxu1  ;;  %v3911_v50 = vpop.f32.mrf.mxu0 }
 0x164   : > { %v1465_v44 = vadd.f32 %v1352_v20, %v4764_v35  ;;  %v4884_v37 = vadd.f32 %v3908_v17, %v1467_v8 }
 0x165   : > { %v3877_v46 = vpop.f32.mrf.mxu1  ;;  %v1659_v47 = vpop.f32.mrf.mxu0 }
 0x166   : > { %v1470_v60 = vadd.f32 %v3877_v46, %v4767_v34  ;;  %v4887_v58 = vadd.f32 %v1646_v43, %v1465_v44 }
 0x167   : > { %v1365_v29 = vpop.f32.mrf.mxu1  ;;  %v3912_v41 = vpop.f32.mrf.mxu0 }
 0x168   : > { %v1468_v16 = vadd.f32 %v1365_v29, %v4770_v49  ;;  %v4890_v1 = vadd.f32 %v3911_v50, %v1470_v60 }
 0x169   : > { %v3878_v2 = vpop.f32.mrf.mxu1  ;;  %v1662_v31 = vpop.f32.mrf.mxu0 }
 0x16a   : > { %v1471_v0 = vadd.f32 %v3878_v2, %v4777_v19  ;;  %v4893_v22 = vadd.f32 %v1659_v47, %v1468_v16 }
 0x16b   : > { %v1368_v35 = vpop.f32.mrf.mxu1  ;;  %v3915_v48 = vpop.f32.mrf.mxu0 }
 0x16c   : > { %v1469_v39 = vadd.f32 %v1368_v35, %v4782_v4  ;;  %v4896_v33 = vadd.f32 %v3912_v41, %v1471_v0 }
 0x16d   : > { %v3881_v34 = vpop.f32.mrf.mxu1  ;;  %v1675_v27 = vpop.f32.mrf.mxu0 }
 0x16e   : > { %v1474_v24 = vadd.f32 %v3881_v34, %v4785_v5  ;;  %v4899_v3 = vadd.f32 %v1662_v31, %v1469_v39 }
 0x16f   : > { %v1381_v49 = vpop.f32.mrf.mxu1  ;;  %v3916_v23 = vpop.f32.mrf.mxu0 }
 0x170   : > { %v1472_v25 = vadd.f32 %v1381_v49, %v4788_v55  ;;  %v4902_v14 = vadd.f32 %v3915_v48, %v1474_v24 }
 0x171   : > { %v3882_v19 = vpop.f32.mrf.mxu1  ;;  %v1678_v7 = vpop.f32.mrf.mxu0 }
 0x172   : > { %v1475_v18 = vadd.f32 %v3882_v19, %v4795_v15  ;;  %v4905_v63 = vadd.f32 %v1675_v27, %v1472_v25 }
 0x173   : > { %v1384_v4 = vpop.f32.mrf.mxu1  ;;  %v3919_v17 = vpop.f32.mrf.mxu0 }
 0x174   : > { %v1473_v51 = vadd.f32 %v1384_v4, %v4800_v21  ;;  %v4908_v26 = vadd.f32 %v3916_v23, %v1475_v18 }
 0x175   : > { %v3885_v5 = vpop.f32.mrf.mxu1  ;;  %v1691_v43 = vpop.f32.mrf.mxu0 }
 0x176   : > { %v1478_v8 = vadd.f32 %v3885_v5, %v4803_v30  ;;  %v4911_v20 = vadd.f32 %v1678_v7, %v1473_v51 }
 0x177   : > { %v1397_v55 = vpop.f32.mrf.mxu1  ;;  %v3920_v50 = vpop.f32.mrf.mxu0 }
 0x178   : > { %v1476_v44 = vadd.f32 %v1397_v55, %v4806_v10  ;;  %v4914_v46 = vadd.f32 %v3919_v17, %v1478_v8 }
 0x179   : > { %v3886_v15 = vpop.f32.mrf.mxu1  ;;  %v1694_v47 = vpop.f32.mrf.mxu0 }
 0x17a   : > { %v1479_v60 = vadd.f32 %v3886_v15, %v4813_v32  ;;  %v4917_v29 = vadd.f32 %v1691_v43, %v1476_v44 }
 0x17b   : > { %v1400_v21 = vpop.f32.mrf.mxu1  ;;  %v3923_v41 = vpop.f32.mrf.mxu0 }
 0x17c   : > { %v1477_v16 = vadd.f32 %v1400_v21, %v4818_v62  ;;  %v4920_v2 = vadd.f32 %v3920_v50, %v1479_v60 }
 0x17d   : > { %v3889_v30 = vpop.f32.mrf.mxu1  ;;  %v1707_v31 = vpop.f32.mrf.mxu0 }
 0x17e   : > { %5296 = vst [vmem:[#allocation4_spill] sm:$0xff] %v4920_v2  ;;  %v1482_v0 = vadd.f32 %v3889_v30, %v4821_v38  ;;  %v4923_v35 = vadd.f32 %v1694_v47, %v1477_v16 }
 0x17f   : > { %v1413_v10 = vpop.f32.mrf.mxu1  ;;  %v3924_v48 = vpop.f32.mrf.mxu0 }
 0x180   : > { %5297 = vst [vmem:[#allocation5_spill] sm:$0xff] %v4923_v35  ;;  %v1480_v39 = vadd.f32 %v1413_v10, %v4824_v28  ;;  %v4926_v34 = vadd.f32 %v3923_v41, %v1482_v0 }
 0x181   : > { %v3890_v32 = vpop.f32.mrf.mxu1  ;;  %v1710_v27 = vpop.f32.mrf.mxu0 }
 0x182   : > { %5298 = vst [vmem:[#allocation6_spill] sm:$0xff] %v4926_v34  ;;  %v1483_v24 = vadd.f32 %v3890_v32, %v4831_v59  ;;  %v4929_v49 = vadd.f32 %v1707_v31, %v1480_v39 }
 0x183   : > { %v1416_v62 = vpop.f32.mrf.mxu1  ;;  %v3927_v23 = vpop.f32.mrf.mxu0 }
 0x184   : > { %5299 = vst [vmem:[#allocation7_spill] sm:$0xff] %v4929_v49  ;;  %v1481_v25 = vadd.f32 %v1416_v62, %v4837_v45  ;;  %v4932_v19 = vadd.f32 %v3924_v48, %v1483_v24 }
 0x185   : > { %v3893_v38 = vpop.f32.mrf.mxu1  ;;  %v1723_v7 = vpop.f32.mrf.mxu0 }
 0x186   : > { %5300 = vst [vmem:[#allocation8_spill] sm:$0xff] %v4932_v19  ;;  %v1486_v18 = vadd.f32 %v3893_v38, %v4840_v12  ;;  %v4935_v4 = vadd.f32 %v1710_v27, %v1481_v25 }
 0x187   : > { %v1429_v28 = vpop.f32.mrf.mxu1  ;;  %v3928_v17 = vpop.f32.mrf.mxu0 }
 0x188   : > { %5301 = vst [vmem:[#allocation9_spill] sm:$0xff] %v4935_v4  ;;  %v1484_v51 = vadd.f32 %v1429_v28, %v4843_v56  ;;  %v4938_v5 = vadd.f32 %v3927_v23, %v1486_v18 }
 0x189   : > { %v3894_v59 = vpop.f32.mrf.mxu1  ;;  %v1726_v43 = vpop.f32.mrf.mxu0 }
 0x18a   : > { %5302 = vst [vmem:[#allocation10_spill] sm:$0xff] %v4938_v5  ;;  %v1487_v8 = vadd.f32 %v3894_v59, %v4847_v36  ;;  %v4941_v55 = vadd.f32 %v1723_v7, %v1484_v51 }
 0x18b   : > { %v1432_v45 = vpop.f32.mrf.mxu1  ;;  %v3931_v50 = vpop.f32.mrf.mxu0 }
 0x18c   : > { %5303 = vst [vmem:[#allocation11_spill] sm:$0xff] %v4941_v55  ;;  %v1485_v44 = vadd.f32 %v1432_v45, %v4851_v57  ;;  %v4944_v15 = vadd.f32 %v3928_v17, %v1487_v8 }
 0x18d   : > { %v3897_v12 = vpop.f32.mrf.mxu1  ;;  %v1739_v47 = vpop.f32.mrf.mxu0 }
 0x18e   : > { %5304 = vst [vmem:[#allocation12_spill] sm:$0xff] %v4944_v15  ;;  %v1490_v60 = vadd.f32 %v3897_v12, %v4854_v61  ;;  %v4947_v21 = vadd.f32 %v1726_v43, %v1485_v44 }
 0x18f   : > { %v1445_v56 = vpop.f32.mrf.mxu1  ;;  %v3932_v41 = vpop.f32.mrf.mxu0 }
 0x190   : > { %5305 = vst [vmem:[#allocation13_spill] sm:$0xff] %v4947_v21  ;;  %v1488_v16 = vadd.f32 %v1445_v56, %v4857_v40  ;;  %v4950_v30 = vadd.f32 %v3931_v50, %v1490_v60 }
 0x191   : > { %v3898_v36 = vpop.f32.mrf.mxu1  ;;  %v1742_v31 = vpop.f32.mrf.mxu0 }
 0x192   : > { %5306 = vst [vmem:[#allocation14_spill] sm:$0xff] %v4950_v30  ;;  %v1491_v0 = vadd.f32 %v3898_v36, %v4860_v6  ;;  %v4953_v10 = vadd.f32 %v1739_v47, %v1488_v16 }
 0x193   : > { %v1448_v57 = vpop.f32.mrf.mxu1  ;;  %v4955_v48 = vpop.f32.mrf.mxu0 }
 0x194   : > { %5307 = vst [vmem:[#allocation15_spill] sm:$0xff] %v4953_v10  ;;  %v1489_v39 = vadd.f32 %v1448_v57, %v4863_v11  ;;  %v4958_v61 = vadd.f32 %v3932_v41, %v1491_v0 }
 0x195   : > { %v3937_v32 = vpop.f32.mrf.mxu1  ;;  %v4960_v27 = vpop.f32.mrf.mxu0 }
 0x196   : > { %5308 = vst [vmem:[#allocation16_spill] sm:$0xff] %v4958_v61  ;;  %v4962_v24 = vadd.f32 %v1742_v31, %v1489_v39 }
 0x197   : > { %v1921_v40 = vpop.f32.mrf.mxu1  ;;  %v4964_v62 = vpop.f32.mrf.mxu0 }
 0x198   : > { %5309 = vst [vmem:[#allocation17_spill] sm:$0xff] %v4962_v24 }
 0x199   : > { %v3938_v23 = vpop.f32.mrf.mxu1  ;;  %v4966_v25 = vpop.f32.mrf.mxu0 }
 0x19b   : > { %v4968_v6 = vpop.f32.mrf.mxu1  ;;  %v4970_v38 = vpop.f32.mrf.mxu0 }
 0x19d   : > { %v4972_v7 = vpop.f32.mrf.mxu1  ;;  %v4974_v11 = vpop.f32.mrf.mxu0 }
 0x19f   : > { %v4976_v18 = vpop.f32.mrf.mxu1  ;;  %v4978_v28 = vpop.f32.mrf.mxu0 }
 0x1a1   : > { %v4980_v17 = vpop.f32.mrf.mxu1  ;;  %v4982_v51 = vpop.f32.mrf.mxu0 }
 0x1a3   : > { %v4984_v59 = vpop.f32.mrf.mxu1  ;;  %v4986_v43 = vpop.f32.mrf.mxu0 }
 0x1a5   : > { %v4988_v8 = vpop.f32.mrf.mxu1  ;;  %v4990_v45 = vpop.f32.mrf.mxu0 }
 0x1a7   : > { %v4992_v50 = vpop.f32.mrf.mxu1  ;;  %v4994_v44 = vpop.f32.mrf.mxu0 }
 0x1a9   : > { %v4996_v12 = vpop.f32.mrf.mxu1  ;;  %v4998_v47 = vpop.f32.mrf.mxu0 }
 0x1ab   : > { %v5000_v60 = vpop.f32.mrf.mxu1  ;;  %v5002_v56 = vpop.f32.mrf.mxu0 }
 0x1ad   : > { %v5004_v41 = vpop.f32.mrf.mxu1  ;;  %v5006_v16 = vpop.f32.mrf.mxu0 }
 0x1af   : > { %v5008_v36 = vpop.f32.mrf.mxu1  ;;  %v5010_v31 = vpop.f32.mrf.mxu0 }
 0x1b1   : > { %v5012_v0 = vpop.f32.mrf.mxu1  ;;  %v5014_v57 = vpop.f32.mrf.mxu0 }
 0x1b3   : > { %v5016_v39 = vpop.f32.mrf.mxu1  ;;  %v5018_v24 = vpop.f32.mrf.mxu0 }
 0x1b4   : > { %5310 = vst [vmem:[#allocation18_spill] sm:$0xff] %v5018_v24 }
 0x1b5   : > { %v5020_v61 = vpop.f32.mrf.mxu1  ;;  %v5022_v10 = vpop.f32.mrf.mxu0 }
 0x1b6   : > { %5311 = vst [vmem:[#allocation19_spill] sm:$0xff] %v5022_v10 }
 0x1b7   : > { %v5024_v30 = vpop.f32.mrf.mxu1  ;;  %v5026_v21 = vpop.f32.mrf.mxu0 }
 0x1b8   : > { %5312 = vst [vmem:[#allocation20_spill] sm:$0xff] %v5026_v21 }
 0x1b9   : > { %v5028_v15 = vpop.f32.mrf.mxu1  ;;  %v5030_v55 = vpop.f32.mrf.mxu0 }
 0x1ba   : > { %5313 = vst [vmem:[#allocation21_spill] sm:$0xff] %v5028_v15  ;;  %5314 = vst [vmem:[#allocation22_spill] sm:$0xff] %v5030_v55 }
 0x1bb   : > { %v5032_v5 = vpop.f32.mrf.mxu1  ;;  %v5034_v4 = vpop.f32.mrf.mxu0 }
 0x1bc   : > { %5315 = vst [vmem:[#allocation23_spill] sm:$0xff] %v5032_v5  ;;  %5316 = vst [vmem:[#allocation24_spill] sm:$0xff] %v5034_v4 }
 0x1bd   : > { %v5036_v19 = vpop.f32.mrf.mxu1  ;;  %v5038_v49 = vpop.f32.mrf.mxu0 }
 0x1be   : > { %5317 = vst [vmem:[#allocation25_spill] sm:$0xff] %v5036_v19  ;;  %5318 = vst [vmem:[#allocation26_spill] sm:$0xff] %v5038_v49 }
 0x1bf   : > { %v5040_v34 = vpop.f32.mrf.mxu1  ;;  %v5042_v35 = vpop.f32.mrf.mxu0 }
 0x1c0   : > { %5319 = vst [vmem:[#allocation27_spill] sm:$0xff] %v5040_v34  ;;  %5320 = vst [vmem:[#allocation28_spill] sm:$0xff] %v5042_v35 }
 0x1c1   : > { %v5044_v10 = vpop.f32.mrf.mxu1  ;;  %v5046_v24 = vpop.f32.mrf.mxu0 }
 0x1c2   : > { %5321 = vst [vmem:[#allocation29_spill] sm:$0xff] %v5044_v10  ;;  %5322 = vst [vmem:[#allocation30_spill] sm:$0xff] %v5046_v24 }
 0x1c3   : > { %v5048_v21 = vpop.f32.mrf.mxu1  ;;  %v5050_v15 = vpop.f32.mrf.mxu0 }
 0x1c4   : > { %5323 = vst [vmem:[#allocation31_spill] sm:$0xff] %v5048_v21  ;;  %5324 = vst [vmem:[#allocation32_spill] sm:$0xff] %v5050_v15 }
 0x1c5   : > { %v5052_v55 = vpop.f32.mrf.mxu1  ;;  %v5054_v5 = vpop.f32.mrf.mxu0 }
 0x1c6   : > { %5325 = vst [vmem:[#allocation33_spill] sm:$0xff] %v5052_v55  ;;  %5326 = vst [vmem:[#allocation34_spill] sm:$0xff] %v5054_v5  ;;  %v2050_v5 = vadd.f32 %v3937_v32, %v4866_v13  ;;  %v5092_v32 = vld [vmem:[%s5294_s2] ss:$0 sm:$0xff] }
 0x1c7   : > { %v5056_v4 = vpop.f32.mrf.mxu1  ;;  %v5058_v19 = vpop.f32.mrf.mxu0 }
 0x1c8   : > { %5327 = vst [vmem:[#allocation35_spill] sm:$0xff] %v5056_v4  ;;  %5328 = vst [vmem:[#allocation36_spill] sm:$0xff] %v5058_v19 }
 0x1c9   : > { %v5060_v49 = vpop.f32.mrf.mxu1  ;;  %v5062_v34 = vpop.f32.mrf.mxu0 }
 0x1ca   : > { %5329 = vst [vmem:[#allocation37_spill] sm:$0xff] %v5060_v49  ;;  %5330 = vst [vmem:[#allocation38_spill] sm:$0xff] %v5062_v34  ;;  %v2048_v34 = vadd.f32 %v1921_v40, %v4869_v53 }
 0x1cb   : > { %v5064_v35 = vpop.f32.mrf.mxu1  ;;  %v5066_v10 = vpop.f32.mrf.mxu0 }
 0x1cc   : > { %5331 = vst [vmem:[#allocation39_spill] sm:$0xff] %v5064_v35  ;;  %5332 = vst [vmem:[#allocation40_spill] sm:$0xff] %v5066_v10  ;;  %v2051_v10 = vadd.f32 %v3938_v23, %v4872_v52  ;;  %v2343_v13 = vadd.f32 %v4960_v27, %v2048_v34 }
 0x1cd   : > { %v5068_v24 = vpop.f32.mrf.mxu1  ;;  %v5070_v21 = vpop.f32.mrf.mxu0 }
 0x1ce   : > { %5333 = vst [vmem:[#allocation41_spill] sm:$0xff] %v5068_v24  ;;  %5334 = vst [vmem:[#allocation42_spill] sm:$0xff] %v5070_v21  ;;  %v2345_v24 = vadd.f32 %v4955_v48, %v2050_v5  ;;  %v2346_v52 = vadd.f32 %v4964_v62, %v2051_v10  ;;  %v2054_v5 = vadd.f32 %v4972_v7, %v4878_v9 }
 0x1cf   : > { %v5072_v15 = vpop.f32.mrf.mxu1  ;;  %v5074_v55 = vpop.f32.mrf.mxu0 }
 0x1d0   : > { %5335 = vst [vmem:[#allocation43_spill] sm:$0xff] %v5072_v15  ;;  %5336 = vst [vmem:[#allocation44_spill] sm:$0xff] %v5074_v55  ;;  %v2049_v55 = vadd.f32 %v4968_v6, %v4875_v42  ;;  %v2052_v42 = vadd.f32 %v4976_v18, %v4881_v54  ;;  %v2053_v54 = vadd.f32 %v4984_v59, %v4887_v58 }
 0x1d1   : > { %v5077_v4 = vpop.f32.mrf.mxu1  ;;  %v5079_v19 = vpop.f32.mrf.mxu0 }
 0x1d2   : > { %5337 = vst [vmem:[#allocation45_spill] sm:$0xff] %v5079_v19  ;;  %v2344_v23 = vadd.f32 %v4966_v25, %v2049_v55 }
 0x1d3   : > { %v5082_v49 = vpop.f32.mrf.mxu1  ;;  %v4039_v35 = vpop.f32.mrf.mxu0 }
 0x1d4   : > { %5338 = vst [vmem:[#allocation46_spill] sm:$0xff] %v5082_v49 }
 0x1d5   : > { %v4005_v21 = vpop.f32.mrf.mxu1  ;;  %v2804_v2 = vpop.f32.mrf.mxu0 }
 0x1d6   : > { %v2639_v15 = vadd.f32 %v4005_v21, %v2345_v24 }
 0x1d7   : > { %v2510_v53 = vpop.f32.mrf.mxu1  ;;  %v4040_v40 = vpop.f32.mrf.mxu0 }
 0x1d8   : > { %v2933_v19 = vadd.f32 %v4039_v35, %v2639_v15  ;;  %v2637_v49 = vadd.f32 %v2510_v53, %v2343_v13  ;;  %v2055_v35 = vadd.f32 %v4980_v17, %v4884_v37  ;;  %v2349_v37 = vadd.f32 %v4970_v38, %v2054_v5 }
 0x1d9   : > { %v4006_v21 = vpop.f32.mrf.mxu1  ;;  %v2807_v34 = vpop.f32.mrf.mxu0  ;;  %v2058_v13 = vadd.f32 %v4988_v8, %v4890_v1 }
 0x1da   : > { %v2971_v48 = vadd.f32 %v5092_v32, %v2933_v19  ;;  %v2931_v27 = vadd.f32 %v2804_v2, %v2637_v49  ;;  %v2640_v24 = vadd.f32 %v4006_v21, %v2346_v52  ;;  %v2347_v19 = vadd.f32 %v4974_v11, %v2052_v42 }
 0x1db   : > { %v2513_v15 = vpop.f32.mrf.mxu1  ;;  %v4043_v10 = vpop.f32.mrf.mxu0  ;;  %v2350_v58 = vadd.f32 %v4978_v28, %v2055_v35  ;;  %v2056_v28 = vadd.f32 %v4992_v50, %v4893_v22 }
 0x1dc   : > { %v3003_v62 = vmax.f32 %v2971_v48, 0.0  ;;  %v2969_v6 = vadd.f32 %v5092_v32, %v2931_v27  ;;  %v2934_v9 = vadd.f32 %v4040_v40, %v2640_v24  ;;  %v2638_v7 = vadd.f32 %v2513_v15, %v2344_v23 }
 0x1dd   : > { %v4009_v2 = vpop.f32.mrf.mxu1  ;;  %v2820_v49 = vpop.f32.mrf.mxu0  ;;  %v2059_v23 = vadd.f32 %v4996_v12, %v4896_v33 }
 0x1de   : > { %v3501_v55 = vpack.c.bf16 %v3003_v62, %v3003_v62  ;;  %v3001_v25 = vmax.f32 %v2969_v6, 0.0  ;;  %v2972_v18 = vadd.f32 %v5092_v32, %v2934_v9  ;;  %v2932_v17 = vadd.f32 %v2807_v34, %v2638_v7 }
 0x1df   : > { %v2643_v53 = vadd.f32 %v4009_v2, %v2349_v37  ;;  %v2526_v40 = vpop.f32.mrf.mxu1  ;;  %v4044_v52 = vpop.f32.mrf.mxu0  ;;  %v2348_v34 = vadd.f32 %v4982_v51, %v2053_v54  ;;  %v2353_v62 = vadd.f32 %v4986_v43, %v2058_v13  ;;  %v2057_v54 = vadd.f32 %v5000_v60, %v4899_v3 }
 0x1e0   : > { %3164 = vst.msk [vmem:[%s5109_s19 + $0x8] sm:$0xf] %vm3161_vm4, %v3501_v55  ;;  %v3499_v38 = vpack.c.bf16 %v3001_v25, %v3001_v25  ;;  %v3004_v59 = vmax.f32 %v2972_v18, 0.0  ;;  %v2970_v11 = vadd.f32 %v5092_v32, %v2932_v17  ;;  %v2641_v5 = vadd.f32 %v2526_v40, %v2347_v19 }
 0x1e1   : > { %v2937_v42 = vadd.f32 %v4043_v10, %v2643_v53  ;;  %v4010_v21 = vpop.f32.mrf.mxu1  ;;  %v2823_v48 = vpop.f32.mrf.mxu0  ;;  %v2351_v55 = vadd.f32 %v4990_v45, %v2056_v28  ;;  %v2354_v60 = vadd.f32 %v4994_v44, %v2059_v23  ;;  %v2060_v40 = vadd.f32 %v5008_v36, %v4905_v63 }
 0x1e2   : > { %3162 = vst.msk [vmem:[%s5109_s19] sm:$0xf] %vm3161_vm4, %v3499_v38  ;;  %v3502_v1 = vpack.c.bf16 %v3004_v59, %v3004_v59  ;;  %v3002_v8 = vmax.f32 %v2970_v11, 0.0  ;;  %v2935_v27 = vadd.f32 %v2820_v49, %v2641_v5  ;;  %v2644_v24 = vadd.f32 %v4010_v21, %v2350_v58 }
 0x1e3   : > { %v2975_v35 = vadd.f32 %v5092_v32, %v2937_v42  ;;  %v2529_v15 = vpop.f32.mrf.mxu1  ;;  %v4047_v10 = vpop.f32.mrf.mxu0  ;;  %v2062_v49 = vadd.f32 %v5004_v41, %v4902_v14  ;;  %v2352_v45 = vadd.f32 %v4998_v47, %v2057_v54  ;;  %v2063_v47 = vadd.f32 %v5012_v0, %v4908_v26 }
 0x1e4   : > { %3165 = vst.msk [vmem:[%s5109_s19 + $0xc] sm:$0xf] %vm3161_vm4, %v3502_v1  ;;  %v3500_v51 = vpack.c.bf16 %v3002_v8, %v3002_v8  ;;  %v2973_v6 = vadd.f32 %v5092_v32, %v2935_v27  ;;  %v2938_v9 = vadd.f32 %v4044_v52, %v2644_v24  ;;  %v2642_v7 = vadd.f32 %v2529_v15, %v2348_v34 }
 0x1e5   : > { %v3007_v22 = vmax.f32 %v2975_v35, 0.0  ;;  %v4013_v50 = vpop.f32.mrf.mxu1  ;;  %v2836_v37 = vpop.f32.mrf.mxu0  ;;  %v2357_v63 = vadd.f32 %v5002_v56, %v2062_v49  ;;  %v2061_v1 = vadd.f32 %v5016_v39, %v4911_v20  ;;  %v2355_v28 = vadd.f32 %v5006_v16, %v2060_v40 }
 0x1e6   : > { %3163 = vst.msk [vmem:[%s5109_s19 + $0x4] sm:$0xf] %vm3161_vm4, %v3500_v51  ;;  %v3005_v33 = vmax.f32 %v2973_v6, 0.0  ;;  %v2976_v12 = vadd.f32 %v5092_v32, %v2938_v9  ;;  %v2936_v43 = vadd.f32 %v2823_v48, %v2642_v7  ;;  %v2647_v2 = vadd.f32 %v4013_v50, %v2353_v62 }
 0x1e7   : > { %v3505_v19 = vpack.c.bf16 %v3007_v22, %v3007_v22  ;;  %v2542_v25 = vpop.f32.mrf.mxu1  ;;  %v4048_v3 = vpop.f32.mrf.mxu0  ;;  %v2064_v6 = vadd.f32 %v5024_v30, %v4917_v29  ;;  %v2358_v7 = vadd.f32 %v5010_v31, %v2063_v47 }
 0x1e8   : > { %v3503_v18 = vpack.c.bf16 %v3005_v33, %v3005_v33  ;;  %v3008_v17 = vmax.f32 %v2976_v12, 0.0  ;;  %v2974_v13 = vadd.f32 %v5092_v32, %v2936_v43  ;;  %v2941_v53 = vadd.f32 %v4047_v10, %v2647_v2  ;;  %v5339_v12 = vld [vmem:[#allocation4_spill] sm:$0xff]  ;;  %v5340_v43 = vld [vmem:[#allocation21_spill] sm:$0xff] }
 0x1e9   : > { %3168 = vst.msk [vmem:[%s5109_s19 + $0x18] sm:$0xf] %vm3161_vm4, %v3505_v19  ;;  %v2645_v14 = vadd.f32 %v2542_v25, %v2351_v55  ;;  %v4014_v41 = vpop.f32.mrf.mxu1  ;;  %v2839_v52 = vpop.f32.mrf.mxu0  ;;  %v2066_v10 = vadd.f32 %v5020_v61, %v4914_v46  ;;  %v2356_v61 = vadd.f32 %v5014_v57, %v2061_v1  ;;  %v2067_v2 = vadd.f32 %v5340_v43, %v5339_v12  ;;  %v5341_v19 = vld [vmem:[#allocation18_spill] sm:$0xff] }
 0x1ea   : > { %3166 = vst.msk [vmem:[%s5109_s19 + $0x10] sm:$0xf] %vm3161_vm4, %v3503_v18  ;;  %v3506_v58 = vpack.c.bf16 %v3008_v17, %v3008_v17  ;;  %v3006_v44 = vmax.f32 %v2974_v13, 0.0  ;;  %v2979_v38 = vadd.f32 %v5092_v32, %v2941_v53  ;;  %v2648_v59 = vadd.f32 %v4014_v41, %v2354_v60  ;;  %v5342_v13 = vld [vmem:[#allocation19_spill] sm:$0xff] }
 0x1eb   : > { %v2939_v11 = vadd.f32 %v2836_v37, %v2645_v14  ;;  %v2545_v5 = vpop.f32.mrf.mxu1  ;;  %v4051_v42 = vpop.f32.mrf.mxu0  ;;  %v2361_v31 = vadd.f32 %v5341_v19, %v2066_v10  ;;  %v2359_v53 = vadd.f32 %v5342_v13, %v2064_v6 }
 0x1ec   : > { %3169 = vst.msk [vmem:[%s5109_s19 + $0x1c] sm:$0xf] %vm3161_vm4, %v3506_v58  ;;  %v3504_v36 = vpack.c.bf16 %v3006_v44, %v3006_v44  ;;  %v3011_v21 = vmax.f32 %v2979_v38, 0.0  ;;  %v2942_v48 = vadd.f32 %v4048_v3, %v2648_v59  ;;  %v2646_v34 = vadd.f32 %v2545_v5, %v2352_v45  ;;  %v5343_v45 = vld [vmem:[#allocation5_spill] sm:$0xff]  ;;  %v5344_v58 = vld [vmem:[#allocation23_spill] sm:$0xff]  ;;  %v5345_v38 = vld [vmem:[#allocation6_spill] sm:$0xff] }
 0x1ed   : > { %v2977_v8 = vadd.f32 %v5092_v32, %v2939_v11  ;;  %v4017_v27 = vpop.f32.mrf.mxu1  ;;  %v2852_v24 = vpop.f32.mrf.mxu0  ;;  %v2065_v44 = vadd.f32 %v5344_v58, %v5343_v45  ;;  %v5346_v59 = vld [vmem:[#allocation25_spill] sm:$0xff]  ;;  %v5360_v58 = vld [vmem:[#allocation11_spill] sm:$0xff] }
 0x1ee   : > { %3167 = vst.msk [vmem:[%s5109_s19 + $0x14] sm:$0xf] %vm3161_vm4, %v3504_v36  ;;  %v3509_v56 = vpack.c.bf16 %v3011_v21, %v3011_v21  ;;  %v2980_v23 = vadd.f32 %v5092_v32, %v2942_v48  ;;  %v2940_v35 = vadd.f32 %v2839_v52, %v2646_v34  ;;  %v2651_v15 = vadd.f32 %v4017_v27, %v2357_v63  ;;  %v5347_v36 = vld [vmem:[#allocation20_spill] sm:$0xff]  ;;  %v5349_v27 = vld [vmem:[#allocation27_spill] sm:$0xff] }
 0x1ef   : > { %v3009_v26 = vmax.f32 %v2977_v8, 0.0  ;;  %v2558_v0 = vpop.f32.mrf.mxu1  ;;  %v4052_v62 = vpop.f32.mrf.mxu0  ;;  %v2070_v11 = vadd.f32 %v5346_v59, %v5345_v38  ;;  %v2362_v21 = vadd.f32 %v5347_v36, %v2067_v2  ;;  %v5348_v8 = vld [vmem:[#allocation7_spill] sm:$0xff] }
 0x1f0   : > { %3172 = vst.msk [vmem:[%s5109_s19 + $0x28] sm:$0xf] %vm3161_vm4, %v3509_v56  ;;  %v3012_v20 = vmax.f32 %v2980_v23, 0.0  ;;  %v2978_v39 = vadd.f32 %v5092_v32, %v2940_v35  ;;  %v2945_v16 = vadd.f32 %v4051_v42, %v2651_v15  ;;  %v2649_v51 = vadd.f32 %v2558_v0, %v2355_v28  ;;  %v5350_v0 = vld [vmem:[#allocation8_spill] sm:$0xff] }
 0x1f1   : > { %v3507_v9 = vpack.c.bf16 %v3009_v26, %v3009_v26  ;;  %v4018_v54 = vpop.f32.mrf.mxu1  ;;  %v2855_v46 = vpop.f32.mrf.mxu0 }
 0x1f2   : > { %v3510_v22 = vpack.c.bf16 %v3012_v20, %v3012_v20  ;;  %v3010_v50 = vmax.f32 %v2978_v39, 0.0  ;;  %v2983_v37 = vadd.f32 %v5092_v32, %v2945_v16  ;;  %v2943_v33 = vadd.f32 %v2852_v24, %v2649_v51  ;;  %v5352_v16 = vld [vmem:[#allocation22_spill] sm:$0xff] }
 0x1f3   : > { %3170 = vst.msk [vmem:[%s5109_s19 + $0x20] sm:$0xf] %vm3161_vm4, %v3507_v9  ;;  %v2652_v29 = vadd.f32 %v4018_v54, %v2358_v7  ;;  %v2561_v30 = vpop.f32.mrf.mxu1  ;;  %v4055_v49 = vpop.f32.mrf.mxu0  ;;  %v2068_v24 = vadd.f32 %v5349_v27, %v5348_v8  ;;  %v2360_v51 = vadd.f32 %v5352_v16, %v2065_v44  ;;  %v5353_v7 = vld [vmem:[#allocation24_spill] sm:$0xff]  ;;  %v5361_v44 = vld [vmem:[#allocation35_spill] sm:$0xff] }
 0x1f4   : > { %3173 = vst.msk [vmem:[%s5109_s19 + $0x2c] sm:$0xf] %vm3161_vm4, %v3510_v22  ;;  %v3508_v55 = vpack.c.bf16 %v3010_v50, %v3010_v50  ;;  %v3015_v57 = vmax.f32 %v2983_v37, 0.0  ;;  %v2981_v25 = vadd.f32 %v5092_v32, %v2943_v33  ;;  %v2650_v3 = vadd.f32 %v2561_v30, %v2356_v61  ;;  %v5354_v37 = vld [vmem:[#allocation9_spill] sm:$0xff]  ;;  %v5355_v33 = vld [vmem:[#allocation31_spill] sm:$0xff]  ;;  %v5356_v30 = vld [vmem:[#allocation26_spill] sm:$0xff] }
 0x1f5   : > { %v2946_v60 = vadd.f32 %v4052_v62, %v2652_v29  ;;  %v4021_v18 = vpop.f32.mrf.mxu1  ;;  %v2868_v17 = vpop.f32.mrf.mxu0  ;;  %v5351_v62 = vld [vmem:[#allocation29_spill] sm:$0xff]  ;;  %v2365_v54 = vadd.f32 %v5353_v7, %v2070_v11  ;;  %v2069_v12 = vadd.f32 %v5355_v33, %v5354_v37  ;;  %v2072_v38 = vadd.f32 %v5361_v44, %v5360_v58 }
 0x1f6   : > { %3171 = vst.msk [vmem:[%s5109_s19 + $0x24] sm:$0xf] %vm3161_vm4, %v3508_v55  ;;  %v3513_v40 = vpack.c.bf16 %v3015_v57, %v3015_v57  ;;  %v3013_v14 = vmax.f32 %v2981_v25, 0.0  ;;  %v2944_v41 = vadd.f32 %v2855_v46, %v2650_v3  ;;  %v2655_v52 = vadd.f32 %v4021_v18, %v2361_v31  ;;  %v5357_v18 = vld [vmem:[#allocation28_spill] sm:$0xff] }
 0x1f7   : > { %v2984_v5 = vadd.f32 %v5092_v32, %v2946_v60  ;;  %v2574_v42 = vpop.f32.mrf.mxu1  ;;  %v4056_v63 = vpop.f32.mrf.mxu0  ;;  %v2071_v20 = vadd.f32 %v5351_v62, %v5350_v0 }
 0x1f8   : > { %3176 = vst.msk [vmem:[%s5109_s19 + $0x38] sm:$0xf] %vm3161_vm4, %v3513_v40  ;;  %v3511_v48 = vpack.c.bf16 %v3013_v14, %v3013_v14  ;;  %v2982_v34 = vadd.f32 %v5092_v32, %v2944_v41  ;;  %v2949_v47 = vadd.f32 %v4055_v49, %v2655_v52  ;;  %v2653_v1 = vadd.f32 %v2574_v42, %v2359_v53  ;;  %v5358_v41 = vld [vmem:[#allocation10_spill] sm:$0xff]  ;;  %v5359_v52 = vld [vmem:[#allocation33_spill] sm:$0xff] }
 0x1f9   : > { %v3016_v28 = vmax.f32 %v2984_v5, 0.0  ;;  %v4022_v56 = vpop.f32.mrf.mxu1  ;;  %v2871_v23 = vpop.f32.mrf.mxu0  ;;  %v2363_v49 = vadd.f32 %v5356_v30, %v2068_v24  ;;  %v2074_v45 = vadd.f32 %v5359_v52, %v5358_v41  ;;  %v5362_v42 = vld [vmem:[#allocation30_spill] sm:$0xff]  ;;  %v5375_v52 = vld [vmem:[#allocation16_spill] sm:$0xff] }
 0x1fa   : > { %3174 = vst.msk [vmem:[%s5109_s19 + $0x30] sm:$0xf] %vm3161_vm4, %v3511_v48  ;;  %v3014_v35 = vmax.f32 %v2982_v34, 0.0  ;;  %v2987_v15 = vadd.f32 %v5092_v32, %v2949_v47  ;;  %v2947_v10 = vadd.f32 %v2868_v17, %v2653_v1  ;;  %v2656_v26 = vadd.f32 %v4022_v56, %v2362_v21  ;;  %v5363_v47 = vld [vmem:[#allocation12_spill] sm:$0xff]  ;;  %v5364_v1 = vld [vmem:[#allocation37_spill] sm:$0xff] }
 0x1fb   : > { %v3514_v39 = vpack.c.bf16 %v3016_v28, %v3016_v28  ;;  %v2577_v6 = vpop.f32.mrf.mxu1  ;;  %v4059_v9 = vpop.f32.mrf.mxu0  ;;  %v2366_v17 = vadd.f32 %v5357_v18, %v2071_v20  ;;  %v2075_v8 = vadd.f32 %v5364_v1, %v5363_v47  ;;  %v5367_v20 = vld [vmem:[#allocation32_spill] sm:$0xff] }
 0x1fc   : > { %v3512_v46 = vpack.c.bf16 %v3014_v35, %v3014_v35  ;;  %v3019_v61 = vmax.f32 %v2987_v15, 0.0  ;;  %v2985_v22 = vadd.f32 %v5092_v32, %v2947_v10  ;;  %v2950_v50 = vadd.f32 %v4056_v63, %v2656_v26  ;;  %v5365_v10 = vld [vmem:[#allocation13_spill] sm:$0xff]  ;;  %v5366_v26 = vld [vmem:[#allocation39_spill] sm:$0xff] }
 0x1fd   : > { %3177 = vst.msk [vmem:[%s5109_s19 + $0x3c] sm:$0xf] %vm3161_vm4, %v3514_v39  ;;  %v2654_v43 = vadd.f32 %v2577_v6, %v2360_v51  ;;  %v4025_v2 = vpop.f32.mrf.mxu1  ;;  %v2884_v29 = vpop.f32.mrf.mxu0  ;;  %v2364_v63 = vadd.f32 %v5362_v42, %v2069_v12  ;;  %v2073_v0 = vadd.f32 %v5366_v26, %v5365_v10  ;;  %v2369_v39 = vadd.f32 %v5367_v20, %v2074_v45  ;;  %v5368_v6 = vld [vmem:[#allocation34_spill] sm:$0xff]  ;;  %v5380_v10 = vld [vmem:[#allocation44_spill] sm:$0xff] }
 0x1fe   : > { %3175 = vst.msk [vmem:[%s5109_s19 + $0x34] sm:$0xf] %vm3161_vm4, %v3512_v46  ;;  %v3517_v19 = vpack.c.bf16 %v3019_v61, %v3019_v61  ;;  %v3017_v31 = vmax.f32 %v2985_v22, 0.0  ;;  %v2988_v55 = vadd.f32 %v5092_v32, %v2950_v50  ;;  %v2659_v57 = vadd.f32 %v4025_v2, %v2365_v54  ;;  %v5369_v22 = vld [vmem:[#allocation14_spill] sm:$0xff]  ;;  %v5370_v50 = vld [vmem:[#allocation41_spill] sm:$0xff]  ;;  %v5371_v2 = vld [vmem:[#allocation36_spill] sm:$0xff] }
 0x1ff   : > { %v2948_v25 = vadd.f32 %v2871_v23, %v2654_v43  ;;  %v2590_v3 = vpop.f32.mrf.mxu1  ;;  %v4060_v60 = vpop.f32.mrf.mxu0  ;;  %v2078_v37 = vadd.f32 %v5370_v50, %v5369_v22  ;;  %v2079_v45 = vadd.f32 %v5077_v4, %v5375_v52 }
 0x200   : > { %3180 = vst.msk [vmem:[%s5109_s19 + $0x48] sm:$0xf] %vm3161_vm4, %v3517_v19  ;;  %v3515_v13 = vpack.c.bf16 %v3017_v31, %v3017_v31  ;;  %v3020_v53 = vmax.f32 %v2988_v55, 0.0  ;;  %v2953_v40 = vadd.f32 %v4059_v9, %v2659_v57  ;;  %v2657_v14 = vadd.f32 %v2590_v3, %v2363_v49  ;;  %v5372_v3 = vld [vmem:[#allocation38_spill] sm:$0xff] }
 0x201   : > { %v2986_v59 = vadd.f32 %v5092_v32, %v2948_v25  ;;  %v4026_v11 = vpop.f32.mrf.mxu1  ;;  %v2887_v5 = vpop.f32.mrf.mxu0  ;;  %v2367_v9 = vadd.f32 %v5368_v6, %v2072_v38  ;;  %v2374_v26 = vadd.f32 %v5380_v10, %v2079_v45 }
 0x202   : > { %3178 = vst.msk [vmem:[%s5109_s19 + $0x40] sm:$0xf] %vm3161_vm4, %v3515_v13  ;;  %v3518_v36 = vpack.c.bf16 %v3020_v53, %v3020_v53  ;;  %v2991_v21 = vadd.f32 %v5092_v32, %v2953_v40  ;;  %v2951_v48 = vadd.f32 %v2884_v29, %v2657_v14  ;;  %v2660_v34 = vadd.f32 %v4026_v11, %v2366_v17  ;;  %v5373_v40 = vld [vmem:[#allocation15_spill] sm:$0xff] }
 0x203   : > { %v3018_v27 = vmax.f32 %v2986_v59, 0.0  ;;  %v2593_v24 = vpop.f32.mrf.mxu1  ;;  %v4063_v28 = vpop.f32.mrf.mxu0  ;;  %v2370_v29 = vadd.f32 %v5371_v2, %v2075_v8  ;;  %v5374_v14 = vld [vmem:[#allocation43_spill] sm:$0xff]  ;;  %v5376_v59 = vld [vmem:[#allocation40_spill] sm:$0xff] }
 0x204   : > { %3181 = vst.msk [vmem:[%s5109_s19 + $0x4c] sm:$0xf] %vm3161_vm4, %v3518_v36  ;;  %v3023_v56 = vmax.f32 %v2991_v21, 0.0  ;;  %v2989_v23 = vadd.f32 %v5092_v32, %v2951_v48  ;;  %v2954_v35 = vadd.f32 %v4060_v60, %v2660_v34  ;;  %v2658_v15 = vadd.f32 %v2593_v24, %v2364_v63  ;;  %v5377_v21 = vld [vmem:[#allocation17_spill] sm:$0xff]  ;;  %v5378_v48 = vld [vmem:[#allocation46_spill] sm:$0xff] }
 0x205   : > { %v3516_v62 = vpack.c.bf16 %v3018_v27, %v3018_v27  ;;  %v4029_v16 = vpop.f32.mrf.mxu1  ;;  %v2900_v51 = vpop.f32.mrf.mxu0  ;;  %v2368_v60 = vadd.f32 %v5372_v3, %v2073_v0  ;;  %v2076_v41 = vadd.f32 %v5374_v14, %v5373_v40  ;;  %v2373_v11 = vadd.f32 %v5376_v59, %v2078_v37 }
 0x206   : > { %v3521_v7 = vpack.c.bf16 %v3023_v56, %v3023_v56  ;;  %v3021_v54 = vmax.f32 %v2989_v23, 0.0  ;;  %v2992_v46 = vadd.f32 %v5092_v32, %v2954_v35  ;;  %v2952_v61 = vadd.f32 %v2887_v5, %v2658_v15  ;;  %v5379_v23 = vld [vmem:[#allocation42_spill] sm:$0xff] }
 0x207   : > { %3179 = vst.msk [vmem:[%s5109_s19 + $0x44] sm:$0xf] %vm3161_vm4, %v3516_v62  ;;  %v2663_v33 = vadd.f32 %v4029_v16, %v2369_v39  ;;  %v2606_v12 = vpop.f32.mrf.mxu1  ;;  %v4064_v43 = vpop.f32.mrf.mxu0  ;;  %v2077_v34 = vadd.f32 %v5378_v48, %v5377_v21  ;;  %v2371_v35 = vadd.f32 %v5379_v23, %v2076_v41 }
 0x208   : > { %3184 = vst.msk [vmem:[%s5109_s19 + $0x58] sm:$0xf] %vm3161_vm4, %v3521_v7  ;;  %v3519_v30 = vpack.c.bf16 %v3021_v54, %v3021_v54  ;;  %v3024_v49 = vmax.f32 %v2992_v46, 0.0  ;;  %v2990_v19 = vadd.f32 %v5092_v32, %v2952_v61  ;;  %v2661_v31 = vadd.f32 %v2606_v12, %v2367_v9  ;;  %v5381_v9 = vld [vmem:[#allocation45_spill] sm:$0xff] }
 0x209   : > { %v2957_v55 = vadd.f32 %v4063_v28, %v2663_v33  ;;  %v4030_v57 = vpop.f32.mrf.mxu1  ;;  %v2903_v25 = vpop.f32.mrf.mxu0  ;;  %v2372_v7 = vadd.f32 %v5381_v9, %v2077_v34 }
 0x20a   : > { %3182 = vst.msk [vmem:[%s5109_s19 + $0x50] sm:$0xf] %vm3161_vm4, %v3519_v30  ;;  %v3522_v18 = vpack.c.bf16 %v3024_v49, %v3024_v49  ;;  %v3022_v17 = vmax.f32 %v2990_v19, 0.0  ;;  %v2955_v13 = vadd.f32 %v2900_v51, %v2661_v31  ;;  %v2664_v53 = vadd.f32 %v4030_v57, %v2370_v29 }
 0x20b   : > { %v2995_v58 = vadd.f32 %v5092_v32, %v2957_v55  ;;  %v2609_v44 = vpop.f32.mrf.mxu1  ;;  %v4067_v38 = vpop.f32.mrf.mxu0 }
 0x20c   : > { %3185 = vst.msk [vmem:[%s5109_s19 + $0x5c] sm:$0xf] %vm3161_vm4, %v3522_v18  ;;  %v3520_v5 = vpack.c.bf16 %v3022_v17, %v3022_v17  ;;  %v2993_v42 = vadd.f32 %v5092_v32, %v2955_v13  ;;  %v2958_v63 = vadd.f32 %v4064_v43, %v2664_v53  ;;  %v2662_v36 = vadd.f32 %v2609_v44, %v2368_v60 }
 0x20d   : > { %v3027_v47 = vmax.f32 %v2995_v58, 0.0  ;;  %v4033_v1 = vpop.f32.mrf.mxu1  ;;  %v2916_v4 = vpop.f32.mrf.mxu0 }
 0x20e   : > { %3183 = vst.msk [vmem:[%s5109_s19 + $0x54] sm:$0xf] %vm3161_vm4, %v3520_v5  ;;  %v3025_v8 = vmax.f32 %v2993_v42, 0.0  ;;  %v2996_v27 = vadd.f32 %v5092_v32, %v2958_v63  ;;  %v2956_v24 = vadd.f32 %v2903_v25, %v2662_v36  ;;  %v2667_v28 = vadd.f32 %v4033_v1, %v2373_v11 }
 0x20f   : > { %v3525_v56 = vpack.c.bf16 %v3027_v47, %v3027_v47  ;;  %v2622_v15 = vpop.f32.mrf.mxu1  ;;  %v4068_v51 = vpop.f32.mrf.mxu0 }
 0x210   : > { %v3523_v0 = vpack.c.bf16 %v3025_v8, %v3025_v8  ;;  %v3028_v62 = vmax.f32 %v2996_v27, 0.0  ;;  %v2994_v20 = vadd.f32 %v5092_v32, %v2956_v24  ;;  %v2961_v39 = vadd.f32 %v4067_v38, %v2667_v28 }
 0x211   : > { %3188 = vst.msk [vmem:[%s5109_s19 + $0x68] sm:$0xf] %vm3161_vm4, %v3525_v56  ;;  %v2665_v16 = vadd.f32 %v2622_v15, %v2371_v35  ;;  %v4034_v6 = vpop.f32.mrf.mxu1  ;;  %v2919_v30 = vpop.f32.mrf.mxu0 }
 0x212   : > { %3186 = vst.msk [vmem:[%s5109_s19 + $0x60] sm:$0xf] %vm3161_vm4, %v3523_v0  ;;  %v3526_v54 = vpack.c.bf16 %v3028_v62, %v3028_v62  ;;  %v3026_v46 = vmax.f32 %v2994_v20, 0.0  ;;  %v2999_v61 = vadd.f32 %v5092_v32, %v2961_v39  ;;  %v2668_v22 = vadd.f32 %v4034_v6, %v2374_v26 }
 0x213   : > { %v2959_v50 = vadd.f32 %v2916_v4, %v2665_v16  ;;  %v2625_v37 = vpop.f32.mrf.mxu1 }
 0x214   : > { %3189 = vst.msk [vmem:[%s5109_s19 + $0x6c] sm:$0xf] %vm3161_vm4, %v3526_v54  ;;  %v3524_v33 = vpack.c.bf16 %v3026_v46, %v3026_v46  ;;  %v3031_v12 = vmax.f32 %v2999_v61, 0.0  ;;  %v2962_v43 = vadd.f32 %v4068_v51, %v2668_v22  ;;  %v2666_v2 = vadd.f32 %v2625_v37, %v2372_v7 }
 0x215   : > { %v2997_v29 = vadd.f32 %v5092_v32, %v2959_v50 }
 0x216   : > { %3187 = vst.msk [vmem:[%s5109_s19 + $0x64] sm:$0xf] %vm3161_vm4, %v3524_v33  ;;  %v3529_v49 = vpack.c.bf16 %v3031_v12, %v3031_v12  ;;  %v3000_v19 = vadd.f32 %v5092_v32, %v2962_v43  ;;  %v2960_v31 = vadd.f32 %v2919_v30, %v2666_v2 }
 0x217   : > { %v3029_v55 = vmax.f32 %v2997_v29, 0.0 }
 0x218   : > { %3192 = vst.msk [vmem:[%s5109_s19 + $0x78] sm:$0xf] %vm3161_vm4, %v3529_v49  ;;  %v3032_v57 = vmax.f32 %v3000_v19, 0.0  ;;  %v2998_v25 = vadd.f32 %v5092_v32, %v2960_v31 }
 0x219   : > { %v3527_v3 = vpack.c.bf16 %v3029_v55, %v3029_v55 }
 0x21a   : > { %v3530_v60 = vpack.c.bf16 %v3032_v57, %v3032_v57  ;;  %v3030_v18 = vmax.f32 %v2998_v25, 0.0 }
 0x21b   : > { %3190 = vst.msk [vmem:[%s5109_s19 + $0x70] sm:$0xf] %vm3161_vm4, %v3527_v3 }
 0x21c   : > { %3193 = vst.msk [vmem:[%s5109_s19 + $0x7c] sm:$0xf] %vm3161_vm4, %v3530_v60  ;;  %v3528_v17 = vpack.c.bf16 %v3030_v18, %v3030_v18 }
 0x21e   : > { %3191 = vst.msk [vmem:[%s5109_s19 + $0x74] sm:$0xf] %vm3161_vm4, %v3528_v17 }
 0x21f PF: > { %s13_s14 = sadd.s32 1, %s4119_s14   ;;  %s5382_s12 = smov %s4115_s13 }
 0x220   : > { %p10_p5 = scmp.ge.s32.totalorder %s13_s14, 4   ;;  %s5383_s13 = smov %s5385_s15 }
 0x222   :  { %12 = sbr.rel (!%p10_p5) target bundleno = 2 (0x2), region = 78 }

</bundles_post_ra>
